<compile_context>
chip_gen: v5e
topology: v5e:2x2
jax: 0.10.0
libtpu: 0.0.40
codegen_flags: <defaults>
</compile_context>

<pallas_src>
import jax
import jax.numpy as jnp
from jax.experimental import pallas as pl
from jax.experimental.pallas import tpu as pltpu

LANE = 128


def _round_up(x, m):
    return ((x + m - 1) // m) * m


def _lanes(n):
    return _round_up(n, LANE)


def _mlp_kernel(x_ref, w1_ref, b1_ref, w2_ref, b2_ref, w3_ref, b3_ref, out_ref):
    # fc1 + relu  (bf16 x bf16 -> f32 accumulate on the MXU); dropout(0.3) is identity at inference.
    h1 = jnp.dot(x_ref[...], w1_ref[...], preferred_element_type=jnp.float32)
    h1 = jnp.maximum(h1 + b1_ref[...], 0.0)                       # (TB, 128) f32
    # fc2 + relu
    h2 = jnp.dot(h1.astype(jnp.bfloat16), w2_ref[...],
                 preferred_element_type=jnp.float32)
    h2 = jnp.maximum(h2 + b2_ref[...], 0.0)                       # (TB, 64) f32
    # fc3 (out dim = 1): VPU multiply + XLU lane reduction; b3 is a scalar in SMEM.
    # TODO(synk): if a bundle dump shows the XLU slot binding on v6e/v7x, move this onto the
    #             (underused) MXU instead; keep the VPU/XLU form on v5e.
    out = jnp.sum(h2 * w3_ref[...], axis=-1) + b3_ref[0]          # (TB,)
    # Lane-dense store: one (1, TB) row per grid step -> dense vst, no masked partial stores.
    out_ref[...] = out[None, :].astype(out_ref.dtype)


def simple_nn_forward(x, params, *, tb=8192):
    """x: (B, input_size) float (cast to bf16 internally). Returns (B,) float32 (matches .squeeze(-1))."""
    w1, b1, w2, b2, w3_row, b3 = params
    B, in_size = x.shape

    # --- honest per-row VMEM footprint (last dims of every tile pad to 128 lanes) ---
    x_row = 2 * 2 * _lanes(in_size)                    # bf16 x tile, double-buffered
    h_row = 4 * _lanes(128) + 2 * _lanes(128) + 4 * _lanes(64)   # f32 h1 + bf16 h1 copy + f32 h2 (lane-padded)
    o_row = 2 * 4                                      # lane-dense f32 out row, double-buffered
    row_bytes = x_row + h_row + o_row
    weight_bytes = 512 * 1024                          # generous bound for (double-buffered) weights/biases

    vmem_budget = 20 * 1024 * 1024                     # per-tile working-set target, safe on every gen
    tb_cap = max(LANE, ((vmem_budget - weight_bytes) // row_bytes) // LANE * LANE)
    tb_req = max(LANE, min(_round_up(tb, LANE), tb_cap))

    # --- tile count: >= 2 (and even when small) so v7x megacore gets balanced work ---
    b_pad0 = _round_up(B, LANE)
    num_tiles = -(-b_pad0 // tb_req)
    if b_pad0 >= 2 * LANE:
        num_tiles = max(2, num_tiles)
        if num_tiles % 2 and num_tiles < 16:
            num_tiles += 1
    tb = _round_up(-(-b_pad0 // num_tiles), LANE)      # even split, multiple of 128, <= tb_req
    b_pad = tb * num_tiles

    x_bf = x.astype(jnp.bfloat16)
    if b_pad != B:
        x_bf = jnp.pad(x_bf, ((0, b_pad - B), (0, 0)))

    # Explicit scoped-VMEM limit derived from the (lane-padded) footprint, with headroom.
    tile_bytes = tb * row_bytes + weight_bytes
    vmem_limit = int(min(48 * 1024 * 1024,
                         max(16 * 1024 * 1024, tile_bytes * 3 // 2 + 2 * 1024 * 1024)))

    flops = 2 * b_pad * (in_size * 128 + 128 * 64 + 64)
    bytes_accessed = (b_pad * in_size * 2                  # x (bf16)
                      + in_size * 128 * 2 + 128 * 64 * 2   # w1, w2 (bf16)
                      + (128 + 64 + 64 + 1) * 4            # b1, b2, w3, b3 (f32)
                      + b_pad * 4)                         # output (f32)

    out = pl.pallas_call(
        _mlp_kernel,
        out_shape=jax.ShapeDtypeStruct((1, b_pad), jnp.float32),
        grid_spec=pltpu.PrefetchScalarGridSpec(
            num_scalar_prefetch=0,
            grid=(num_tiles,),
            in_specs=[
                pl.BlockSpec((tb, in_size), lambda i: (i, 0)),       # x: streamed per tile
                pl.BlockSpec(w1.shape, lambda i: (0, 0)),            # weights/biases: VMEM-resident
                pl.BlockSpec(b1.shape, lambda i: (0, 0)),
                pl.BlockSpec(w2.shape, lambda i: (0, 0)),
                pl.BlockSpec(b2.shape, lambda i: (0, 0)),
                pl.BlockSpec(w3_row.shape, lambda i: (0, 0)),
                pl.BlockSpec(memory_space=pltpu.MemorySpace.SMEM),   # b3: scalar in SMEM
            ],
            out_specs=pl.BlockSpec((1, tb), lambda i: (0, i)),       # lane-dense row per tile
        ),
        compiler_params=pltpu.CompilerParams(
            dimension_semantics=("parallel",),                       # rows independent -> megacore-shardable
            vmem_limit_bytes=vmem_limit,
        ),
        cost_estimate=pl.CostEstimate(
            flops=int(flops), transcendentals=0, bytes_accessed=int(bytes_accessed)),
    )(x_bf, w1, b1, w2, b2, w3_row, b3)
    return out[0, :B]  # drop padding, squeeze(-1)


def init_params(key, input_size):
    """Deterministic init matching nn.Linear's U(-1/sqrt(fan_in), 1/sqrt(fan_in)).

    Weights stored (in, out); w1/w2 in bf16 (MXU operands), biases + fc3 row in f32.
    """
    dims = [(input_size, 128), (128, 64), (64, 1)]
    raw = []
    keys = jax.random.split(key, 2 * len(dims))
    for idx, (fan_in, fan_out) in enumerate(dims):
        bound = 1.0 / jnp.sqrt(fan_in)
        w = jax.random.uniform(keys[2 * idx], (fan_in, fan_out),
                               minval=-bound, maxval=bound, dtype=jnp.float32)
        b = jax.random.uniform(keys[2 * idx + 1], (1, fan_out),
                               minval=-bound, maxval=bound, dtype=jnp.float32)
        raw += [w, b]
    w1, b1, w2, b2, w3, b3 = raw
    return (w1.astype(jnp.bfloat16), b1,
            w2.astype(jnp.bfloat16), b2,
            w3.T,                    # (1, 64) f32 row for the VPU multiply-reduce
            b3.reshape(1))           # (1,) f32 scalar -> SMEM


if __name__ == "__main__":
    key = jax.random.PRNGKey(0)
    k_x, k_p = jax.random.split(key)

    batch, input_size = 300, 32         # small; 300 -> 2 balanced tiles of 256 rows (512 padded)
    x = jax.random.normal(k_x, (batch, input_size), dtype=jnp.float32)
    params = init_params(k_p, input_size)

    y = simple_nn_forward(x, params)
    jax.block_until_ready(y)

    # Reference in plain JAX, mirroring the kernel's numerics (bf16 inputs/weights, f32 accumulate;
    # dropout is identity in eval mode).
    w1, b1, w2, b2, w3_row, b3 = params
    hp = jax.lax.Precision.HIGHEST
    xf = x.astype(jnp.bfloat16).astype(jnp.float32)
    w1f = w1.astype(jnp.float32)
    w2f = w2.astype(jnp.float32)
    h1 = jnp.maximum(jnp.dot(xf, w1f, precision=hp) + b1, 0.0)
    h1 = h1.astype(jnp.bfloat16).astype(jnp.float32)
    h2 = jnp.maximum(jnp.dot(h1, w2f, precision=hp) + b2, 0.0)
    y_ref = jnp.sum(h2 * w3_row, axis=-1) + b3[0]

    assert y.shape == (batch,), y.shape
    err = float(jnp.max(jnp.abs(y - y_ref)))
    assert jnp.allclose(y, y_ref, atol=2e-3, rtol=2e-3), f"max abs err {err}"

    print("KERNEL_OK")
</pallas_src>

<mosaic_0001>
module attributes {stable_mosaic.version = 11 : i64} {
  func.func @_mlp_kernel(%arg0: i32, %arg1: memref<256x32xbf16, #tpu.memory_space<vmem>>, %arg2: memref<32x128xbf16, #tpu.memory_space<vmem>>, %arg3: memref<1x128xf32, #tpu.memory_space<vmem>>, %arg4: memref<128x64xbf16, #tpu.memory_space<vmem>>, %arg5: memref<1x64xf32, #tpu.memory_space<vmem>>, %arg6: memref<1x64xf32, #tpu.memory_space<vmem>>, %arg7: memref<1xf32, #tpu.memory_space<smem>>, %arg8: memref<1x256xf32, #tpu.memory_space<vmem>>) attributes {dimension_semantics = [#tpu.dimension_semantics<parallel>], iteration_bounds = array<i64: 2>, scalar_prefetch = 0 : i64, scratch_operands = 0 : i64, tpu.core_type = #tpu.core_type<tc>, window_params = [{transform_indices = @transform_0, window_bounds = array<i64: 256, 32>}, {pipeline_mode = #tpu.pipeline_mode<synchronous>, transform_indices = @transform_1, window_bounds = array<i64: 32, 128>}, {pipeline_mode = #tpu.pipeline_mode<synchronous>, transform_indices = @transform_2, window_bounds = array<i64: 1, 128>}, {pipeline_mode = #tpu.pipeline_mode<synchronous>, transform_indices = @transform_3, window_bounds = array<i64: 128, 64>}, {pipeline_mode = #tpu.pipeline_mode<synchronous>, transform_indices = @transform_4, window_bounds = array<i64: 1, 64>}, {pipeline_mode = #tpu.pipeline_mode<synchronous>, transform_indices = @transform_5, window_bounds = array<i64: 1, 64>}, {transform_indices = @transform_6, window_bounds = array<i64: 1>}, {transform_indices = @transform_7, window_bounds = array<i64: 1, 256>}]} {
    %c0 = arith.constant 0 : index
    %c0_0 = arith.constant 0 : index
    %0 = vector.load %arg1[%c0, %c0_0] : memref<256x32xbf16, #tpu.memory_space<vmem>>, vector<256x32xbf16>
    %c0_1 = arith.constant 0 : index
    %c0_2 = arith.constant 0 : index
    %1 = vector.load %arg2[%c0_1, %c0_2] : memref<32x128xbf16, #tpu.memory_space<vmem>>, vector<32x128xbf16>
    %cst = arith.constant dense<0.000000e+00> : vector<256x128xf32>
    %2 = tpu.matmul %0, %1, %cst {dimension_numbers = #tpu.dot_dimension_numbers<[1], [0], [0], [1], [0, 0, 1, 1], [], []>} : vector<256x32xbf16>, vector<32x128xbf16>, vector<256x128xf32> -> vector<256x128xf32>
    %c0_3 = arith.constant 0 : index
    %c0_4 = arith.constant 0 : index
    %3 = vector.load %arg3[%c0_3, %c0_4] : memref<1x128xf32, #tpu.memory_space<vmem>>, vector<1x128xf32>
    %4 = vector.broadcast %3 : vector<1x128xf32> to vector<256x128xf32>
    %5 = arith.addf %2, %4 : vector<256x128xf32>
    %cst_5 = arith.constant 0.000000e+00 : f32
    %6 = vector.broadcast %cst_5 : f32 to vector<256x128xf32>
    %7 = arith.maximumf %5, %6 : vector<256x128xf32>
    %8 = arith.truncf %7 : vector<256x128xf32> to vector<256x128xbf16>
    %c0_6 = arith.constant 0 : index
    %c0_7 = arith.constant 0 : index
    %9 = vector.load %arg4[%c0_6, %c0_7] : memref<128x64xbf16, #tpu.memory_space<vmem>>, vector<128x64xbf16>
    %cst_8 = arith.constant dense<0.000000e+00> : vector<256x64xf32>
    %10 = tpu.matmul %8, %9, %cst_8 {dimension_numbers = #tpu.dot_dimension_numbers<[1], [0], [0], [1], [0, 0, 1, 1], [], []>} : vector<256x128xbf16>, vector<128x64xbf16>, vector<256x64xf32> -> vector<256x64xf32>
    %c0_9 = arith.constant 0 : index
    %c0_10 = arith.constant 0 : index
    %11 = vector.load %arg5[%c0_9, %c0_10] : memref<1x64xf32, #tpu.memory_space<vmem>>, vector<1x64xf32>
    %12 = vector.broadcast %11 : vector<1x64xf32> to vector<256x64xf32>
    %13 = arith.addf %10, %12 : vector<256x64xf32>
    %cst_11 = arith.constant 0.000000e+00 : f32
    %14 = vector.broadcast %cst_11 : f32 to vector<256x64xf32>
    %15 = arith.maximumf %13, %14 : vector<256x64xf32>
    %c0_12 = arith.constant 0 : index
    %c0_13 = arith.constant 0 : index
    %16 = vector.load %arg6[%c0_12, %c0_13] : memref<1x64xf32, #tpu.memory_space<vmem>>, vector<1x64xf32>
    %17 = vector.broadcast %16 : vector<1x64xf32> to vector<256x64xf32>
    %18 = arith.mulf %15, %17 : vector<256x64xf32>
    %cst_14 = arith.constant dense<0.000000e+00> : vector<256xf32>
    %19 = vector.multi_reduction <add>, %18, %cst_14 [1] : vector<256x64xf32> to vector<256xf32>
    %c0_15 = arith.constant 0 : index
    %20 = memref.load %arg7[%c0_15] : memref<1xf32, #tpu.memory_space<smem>>
    %21 = vector.broadcast %20 : f32 to vector<256xf32>
    %22 = arith.addf %19, %21 : vector<256xf32>
    %23 = vector.shape_cast %22 : vector<256xf32> to vector<1x256xf32>
    %c0_16 = arith.constant 0 : index
    %c0_17 = arith.constant 0 : index
    %24 = vector.load %arg8[%c0_16, %c0_17] : memref<1x256xf32, #tpu.memory_space<vmem>>, vector<1x256xf32>
    tpu.vector_store %arg8[%c0_16, %c0_17], %23 {strides = array<i32>} : memref<1x256xf32, #tpu.memory_space<vmem>>, vector<1x256xf32>,
    return
  }
  func.func @transform_0(%arg0: i32) -> (i32, i32) {
    %c0_i32 = arith.constant 0 : i32
    %c0_i32_0 = arith.constant 0 : i32
    return %arg0, %c0_i32 : i32, i32
  }
  func.func @transform_1(%arg0: i32) -> (i32, i32) {
    %c0_i32 = arith.constant 0 : i32
    %c0_i32_0 = arith.constant 0 : i32
    %c0_i32_1 = arith.constant 0 : i32
    return %c0_i32, %c0_i32_0 : i32, i32
  }
  func.func @transform_2(%arg0: i32) -> (i32, i32) {
    %c0_i32 = arith.constant 0 : i32
    %c0_i32_0 = arith.constant 0 : i32
    %c0_i32_1 = arith.constant 0 : i32
    return %c0_i32, %c0_i32_0 : i32, i32
  }
  func.func @transform_3(%arg0: i32) -> (i32, i32) {
    %c0_i32 = arith.constant 0 : i32
    %c0_i32_0 = arith.constant 0 : i32
    %c0_i32_1 = arith.constant 0 : i32
    return %c0_i32, %c0_i32_0 : i32, i32
  }
  func.func @transform_4(%arg0: i32) -> (i32, i32) {
    %c0_i32 = arith.constant 0 : i32
    %c0_i32_0 = arith.constant 0 : i32
    %c0_i32_1 = arith.constant 0 : i32
    return %c0_i32, %c0_i32_0 : i32, i32
  }
  func.func @transform_5(%arg0: i32) -> (i32, i32) {
    %c0_i32 = arith.constant 0 : i32
    %c0_i32_0 = arith.constant 0 : i32
    %c0_i32_1 = arith.constant 0 : i32
    return %c0_i32, %c0_i32_0 : i32, i32
  }
  func.func @transform_6(%arg0: i32) -> i32 {
    %c0_i32 = arith.constant 0 : i32
    %c0_i32_0 = arith.constant 0 : i32
    return %c0_i32 : i32
  }
  func.func @transform_7(%arg0: i32) -> (i32, i32) {
    %c0_i32 = arith.constant 0 : i32
    %c0_i32_0 = arith.constant 0 : i32
    return %c0_i32, %arg0 : i32, i32
  }
}

</mosaic_0001>

<bundles_post_ra>
// kernel: tpu_custom_call.1
= control target key start
LH: loop header
LB: loop body
LE: loop exit
PB: predicated region body
PF: predicated region fallthrough
CT: control target
= control target key end

     0   :  { %s2654_s0 = inlined_call_operand.vmem [shape: bf16[512,32], index: 0, kind: input, shape index: {}]   ;;  %s2655_s1 = inlined_call_operand.vmem [shape: bf16[32,128], index: 1, kind: input, shape index: {}]   ;;  %s2656_s2 = inlined_call_operand.vmem [shape: f32[1,128], index: 2, kind: input, shape index: {}]   ;;  %s2657_s3 = inlined_call_operand.vmem [shape: bf16[128,64], index: 3, kind: input, shape index: {}]   ;;  %s2658_s4 = inlined_call_operand.vmem [shape: f32[1,64], index: 4, kind: input, shape index: {}]   ;;  %s2659_s5 = inlined_call_operand.vmem [shape: f32[1,64], index: 5, kind: input, shape index: {}]   ;;  %s2660_s6 = inlined_call_operand.<no memory space> [shape: f32[1], index: 6, kind: input, shape index: {}]   ;;  %s2661_s7 = inlined_call_operand.hbm [shape: f32[1,512], index: 7, kind: output, shape index: {}]  }
   0x1   :  { %12 = sst [smem:[#allocation2]] %s2660_s6 }
   0x2   :  { %13 = vsyncpa [#allocation4], 0 }
   0x3   :  { %15 = vsyncpa [#allocation4 + $0x1], 0  ;;  %s2137_s26 = smov 0   ;;  %s2139_s27 = smov 0  }
   0x4   :  { %s2141_s28 = smov 0   ;;  %s2143_s29 = smov 0  }
   0x5 LB: > { %s2158_s6 = sadd.s32 4294967295, %s2091_s29   ;;  %s1813_s30 = sadd.s32 4294967294, %s2091_s29   ;;  %s2091_s29 = sphi %s2143_s29, %s2667_s29   ;;  %s2087_s28 = sphi %s2141_s28, %s2666_s28   ;;  %s2083_s27 = sphi %s2139_s27, %s2665_s27   ;;  %s2079_s26 = sphi %s2137_s26, %s2664_s26  }
   0x6   : > { %s2162_s8 = sadd.s32 1, %s2091_s29   ;;  %s180_s9 = sadd.s32 1, %s2087_s28 }
   0x7   : > { %s177_s10 = ssub.s32 %s2091_s29, %s2162_s8  ;;  %p190_p0 = scmp.ne.s32.totalorder %s2087_s28, %s2083_s27 }
   0x8   : > { %p178_p1 = scmp.eq.s32.totalorder %s177_s10, 0  ;;  %p191_p2 = scmp.eq.s32.totalorder %s2158_s6, 1 }
   0x9   : > { %p196_p3 = scmp.ne.s32.totalorder %s2083_s27, %s2079_s26  ;;  %p197_p4 = scmp.eq.s32.totalorder %s1813_s30, 1 }
   0xa   : > { %s2173_s11 = scalar_select %p178_p1, %s2087_s28, %s180_s9  }
   0xb   : > { %p2175_p5 = por %p191_p2, %p190_p0  ;;  %p2179_p6 = por %p197_p4, %p196_p3 }
   0xc   : > { %p1816_p7 = scmp.ge.s32.totalorder %s2091_s29, 1  ;;  %p242_p8 = scmp.lt.s32.totalorder %s2091_s29, 3 }
   0xe   : > { %p243_p9 = pnand %p1816_p7, %p242_p8 }
   0xf   : > { %s1818_s16 = sshll.u32 (!%p243_p9), %s2158_s6, 5  ;;  %s271_s23 = sand.u32 (!%p243_p9), 1, %s2083_s27  }
  0x10   : > { %246 = sbr.rel (%p243_p9) target bundleno = 1069 (0x42d), region = 48  ;;  %p275_p10 = scmp.lt.s32.totalorder (!%p243_p9), %s1818_s16, 63 }
  0x11   : > { %s1817_s24 = sshll.u32 (!%p243_p9), %s271_s23, 1  ;;  %s1941_s25 = sshll.u32 (!%p243_p9), %s2158_s6, 1 }
  0x12   : > { %s1749_s10 = scalar_lea.hbm (!%p243_p9), %s2661_s7, %s1941_s25  ;;  %s273_s6 = scalar_lea.vmem (!%p243_p9), [#allocation3], %s1817_s24 }
  0x13   : > { %s1751_s14 = sshll.u32 (!%p243_p9), %s273_s6, 4  ;;  %s1753_s15 = sshll.u32 (!%p243_p9), %s1749_s10, 4  ;;  %s1752_s14 = int_to_ptr.vmem [resolvable:$true] %s1751_s14  ;;  %s1754_s15 = int_to_ptr.hbm [resolvable:$true] %s1753_s15 }
  0x14   : > { %s2049_s20 = scalar_lea.hbm (!%p243_p9), %s2661_s7, 4 }
  0x15   : > { %v1961_v0 = vld [vmem:[%s2655_s1 + $0x8] sm:$0xff]  ;;  %v1960_v1 = vld [vmem:[%s2655_s1] sm:$0xff]  ;;  %s2669_s16 = smov (!%p275_p10, %s1818_s16), 63  ;;  %vm414_vm0 = vcmask 261120   ;;  %v1969_v7 = vld [vmem:[%s2657_s3 + $0x38] sm:$0xff]  ;;  %vm825_vm1 = vcmask 523264  }
  0x16   : > { %469 = vmatpush.bf16.msra.mxu0 %v1961_v0  ;;  %1970 = vmatpush.bf16.msra.mxu3 %v1961_v0  ;;  %s1819_s19 = sshll.u32 %s2669_s16, 2  ;;  %v1968_v9 = vld [vmem:[%s2657_s3 + $0x30] sm:$0xff]  ;;  %v1967_v10 = vld [vmem:[%s2657_s3 + $0x28] sm:$0xff]  ;;  %v1966_v11 = vld [vmem:[%s2657_s3 + $0x20] sm:$0xff]  ;;  %vm1640_vm2 = vcmask 130112   ;;  %vm1644_vm3 = vcmask 195712  }
  0x17   : > { %s2195_s22 = scalar_lea.vmem %s2654_s0, %s1819_s19  ;;  %668 = vmatpush.bf16.msra.mxu1 %v1969_v7  ;;  %1972 = vmatpush.bf16.msra.mxu2 %v1969_v7  ;;  %v1965_v12 = vld [vmem:[%s2657_s3 + $0x18] sm:$0xff]  ;;  %v1964_v14 = vld [vmem:[%s2657_s3 + $0x10] sm:$0xff]  ;;  %v1963_v15 = vld [vmem:[%s2657_s3 + $0x8] sm:$0xff]  ;;  %vm1648_vm4 = vcmask 261312   ;;  %vm1652_vm5 = vcmask 326912   ;;  %vm1656_vm6 = vcmask 392512  }
  0x18   : > { %v1944_v2 = vld [vmem:[%s2195_s22] sm:$0xff]  ;;  %v1945_v3 = vld [vmem:[%s2195_s22 + $0x8] sm:$0xff]  ;;  %v1946_v4 = vld [vmem:[%s2195_s22 + $0x10] sm:$0xff]  ;;  %vm1660_vm7 = vcmask 458112   ;;  %vm1664_vm8 = vcmask 523712   ;;  %vm1668_vm9 = vcmask 589312  }
  0x19   : > { %v1947_v5 = vld [vmem:[%s2195_s22 + $0x18] sm:$0xff]  ;;  %v1948_v6 = vld [vmem:[%s2195_s22 + $0x20] sm:$0xff]  ;;  %v1949_v8 = vld [vmem:[%s2195_s22 + $0x28] sm:$0xff]  ;;  %vm1672_vm10 = vcmask 654912   ;;  %vm1676_vm11 = vcmask 720512   ;;  %vm1680_vm12 = vcmask 786112  }
  0x1a   : > { %470 = vmatpush.bf16.msra.mxu0 %v1960_v1  ;;  %1971 = vmatpush.bf16.msra.mxu3 %v1960_v1  ;;  %v1950_v13 = vld [vmem:[%s2195_s22 + $0x30] sm:$0xff]  ;;  %v1962_v16 = vld [vmem:[%s2657_s3] sm:$0xff]  ;;  %v1951_v17 = vld [vmem:[%s2195_s22 + $0x38] sm:$0xff]  ;;  %vm1684_vm13 = vcmask 851712   ;;  %vm1688_vm14 = vcmask 917312   ;;  %vm1692_vm15 = vcmask 982912  }
  0x1b   : > { %669 = vmatpush.bf16.msra.mxu1 %v1968_v9  ;;  %1973 = vmatpush.bf16.msra.mxu2 %v1968_v9  ;;  %v1953_v18 = vld [vmem:[%s2195_s22 + $0x48] sm:$0xff]  ;;  %v1952_v19 = vld [vmem:[%s2195_s22 + $0x40] sm:$0xff]  ;;  %v1954_v27 = vld [vmem:[%s2195_s22 + $0x50] sm:$0xff]  ;;  %s2043_s16 = sshra.s32 %s1754_s15, 4  ;;  %s2044_s16 = int_to_ptr.hbm [resolvable:$true] %s2043_s16 }
  0x1c   : > { %v2243_v21 = vld [vmem:[%s2656_s2] ss:$0 sm:$0xff]  ;;  %v1955_v51 = vld [vmem:[%s2195_s22 + $0x58] sm:$0xff]  ;;  %s2045_s17 = scalar_lea.hbm %s2044_s16, 2  ;;  %p2050_p0 = scmp.lt.s32.totalorder %s2044_s16, %s2661_s7 }
  0x1d   : > { %1892 = vmatmul.msk.bf16.vlgmr.msra.gmra.mxu0 %vm414_vm0, %v1944_v2  ;;  %1901 = vmatmul.msk.bf16.vlgmr.msra.gmra.mxu3 %vm414_vm0, %v1953_v18  ;;  %v1956_v59 = vld [vmem:[%s2195_s22 + $0x60] sm:$0xff]  ;;  %p2046_p11 = scmp.ne.s32.totalorder %s2044_s16, %s2045_s17  ;;  %p2051_p1 = scmp.lt.s32.totalorder %s2049_s20, %s2045_s17 }
  0x1f   : > { %670 = vmatpush.bf16.msra.mxu1 %v1967_v10  ;;  %1974 = vmatpush.bf16.msra.mxu2 %v1967_v10  ;;  %p2047_p12 = pnand %p2046_p11, %p2175_p5  ;;  %p2052_p2 = por %p2051_p1, %p2050_p0 }
  0x21   : > { %p2048_p13 = pneg %p2047_p12 }
  0x23   : > { %671 = vmatpush.bf16.msra.mxu1 %v1966_v11  ;;  %1975 = vmatpush.bf16.msra.mxu2 %v1966_v11  ;;  %p2053_p3 = pnand %p2052_p2, %p2048_p13 }
  0x27   : > { %672 = vmatpush.bf16.msra.mxu1 %v1965_v12  ;;  %1976 = vmatpush.bf16.msra.mxu2 %v1965_v12 }
  0x2b   : > { %673 = vmatpush.bf16.msra.mxu1 %v1964_v14  ;;  %1977 = vmatpush.bf16.msra.mxu2 %v1964_v14 }
  0x2d   : > { %1893 = vmatmul.msk.bf16.gmra.mxu0 %vm414_vm0, %v1945_v3  ;;  %1902 = vmatmul.msk.bf16.gmra.mxu3 %vm414_vm0, %v1954_v27 }
  0x2f   : > { %674 = vmatpush.bf16.msra.mxu1 %v1963_v15  ;;  %1978 = vmatpush.bf16.msra.mxu2 %v1963_v15 }
  0x33   : > { %675 = vmatpush.bf16.msra.mxu1 %v1962_v16  ;;  %1979 = vmatpush.bf16.msra.mxu2 %v1962_v16 }
  0x3d   : > { %1894 = vmatmul.msk.bf16.gmra.mxu0 %vm414_vm0, %v1946_v4  ;;  %1903 = vmatmul.msk.bf16.gmra.mxu3 %vm414_vm0, %v1955_v51 }
  0x4d   : > { %1895 = vmatmul.msk.bf16.gmra.mxu0 %vm414_vm0, %v1947_v5  ;;  %1904 = vmatmul.msk.bf16.gmra.mxu3 %vm414_vm0, %v1956_v59 }
  0x5d   : > { %1896 = vmatmul.msk.bf16.gmra.mxu0 %vm414_vm0, %v1948_v6 }
  0x6d   : > { %1897 = vmatmul.msk.bf16.gmra.mxu0 %vm414_vm0, %v1949_v8 }
  0x7d   : > { %1898 = vmatmul.msk.bf16.gmra.mxu0 %vm414_vm0, %v1950_v13 }
  0x8d   : > { %1899 = vmatmul.msk.bf16.gmra.mxu0 %vm414_vm0, %v1951_v17 }
  0x9a   : > { %v472_v20 = vpop.f32.mrf.mxu0 }
  0x9b   : > { %v473_v22 = vadd.f32 %v2243_v21, %v472_v20 }
  0x9d   : > { %1900 = vmatmul.msk.bf16.gmra.mxu0 %vm414_vm0, %v1952_v19  ;;  %v552_v25 = vmax.f32 %v473_v22, 0.0  ;;  %v1957_v19 = vld [vmem:[%s2195_s22 + $0x68] sm:$0xff] }
  0x9e   : > { %1905 = vmatmul.msk.bf16.gmra.mxu3 %vm414_vm0, %v1957_v19 }
  0xa0   : > { %v517_v17 = vpop.f32.mrf.mxu3 }
  0xa2   : > { %v474_v23 = vpop.f32.mrf.mxu0 }
  0xa3   : > { %v475_v24 = vadd.f32 %v2243_v21, %v474_v23  ;;  %v2274_v23 = vld [vmem:[%s2658_s4] ss:$0 sm:$0xff] }
  0xa5   : > { %v553_v26 = vmax.f32 %v475_v24, 0.0 }
  0xa7   : > { %v584_v28 = vpack.c.bf16 %v553_v26, %v552_v25 }
  0xa8   : > { %v519_v27 = vpop.f32.mrf.mxu3 }
  0xa9   : > { %676 = vmatmul.bf16.vlgmr.msra.gmra.mxu1 %v584_v28 }
  0xaa   : > { %v477_v29 = vpop.f32.mrf.mxu0 }
  0xab   : > { %v478_v30 = vadd.f32 %v2243_v21, %v477_v29 }
  0xad   : > { %v554_v33 = vmax.f32 %v478_v30, 0.0  ;;  %v2281_v30 = vld [vmem:[%s2659_s5] ss:$0 sm:$0xff] }
  0xb2   : > { %v479_v31 = vpop.f32.mrf.mxu0 }
  0xb3   : > { %v480_v32 = vadd.f32 %v2243_v21, %v479_v31 }
  0xb5   : > { %v555_v34 = vmax.f32 %v480_v32, 0.0 }
  0xb7   : > { %v585_v35 = vpack.c.bf16 %v555_v34, %v554_v33  ;;  %v518_v34 = vadd.f32 %v2243_v21, %v517_v17 }
  0xb9   : > { %681 = vmatmul.bf16.gmra.mxu1 %v585_v35  ;;  %v520_v35 = vadd.f32 %v2243_v21, %v519_v27 }
  0xba   : > { %v482_v36 = vpop.f32.mrf.mxu0 }
  0xbb   : > { %v483_v37 = vadd.f32 %v2243_v21, %v482_v36 }
  0xbd   : > { %v556_v40 = vmax.f32 %v483_v37, 0.0 }
  0xc2   : > { %v484_v38 = vpop.f32.mrf.mxu0 }
  0xc3   : > { %v485_v39 = vadd.f32 %v2243_v21, %v484_v38  ;;  %v522_v38 = vpop.f32.mrf.mxu3 }
  0xc4   : > { %v523_v51 = vadd.f32 %v2243_v21, %v522_v38 }
  0xc5   : > { %v557_v41 = vmax.f32 %v485_v39, 0.0 }
  0xc7   : > { %v586_v42 = vpack.c.bf16 %v557_v41, %v556_v40  ;;  %v570_v40 = vmax.f32 %v518_v34, 0.0  ;;  %v571_v41 = vmax.f32 %v520_v35, 0.0 }
  0xc9   : > { %686 = vmatmul.bf16.gmra.mxu1 %v586_v42 }
  0xca   : > { %v487_v43 = vpop.f32.mrf.mxu0 }
  0xcb   : > { %v488_v44 = vadd.f32 %v2243_v21, %v487_v43 }
  0xcd   : > { %v558_v47 = vmax.f32 %v488_v44, 0.0  ;;  %v593_v44 = vpack.c.bf16 %v571_v41, %v570_v40 }
  0xd2   : > { %v489_v45 = vpop.f32.mrf.mxu0 }
  0xd3   : > { %v490_v46 = vadd.f32 %v2243_v21, %v489_v45 }
  0xd5   : > { %v559_v48 = vmax.f32 %v490_v46, 0.0 }
  0xd7   : > { %v587_v49 = vpack.c.bf16 %v559_v48, %v558_v47  ;;  %v524_v48 = vpop.f32.mrf.mxu3 }
  0xd9   : > { %691 = vmatmul.bf16.gmra.mxu1 %v587_v49 }
  0xda   : > { %v492_v50 = vpop.f32.mrf.mxu0 }
  0xdb   : > { %v493_v52 = vadd.f32 %v2243_v21, %v492_v50 }
  0xdd   : > { %v560_v55 = vmax.f32 %v493_v52, 0.0  ;;  %v525_v52 = vadd.f32 %v2243_v21, %v524_v48 }
  0xe2   : > { %v494_v53 = vpop.f32.mrf.mxu0 }
  0xe3   : > { %v495_v54 = vadd.f32 %v2243_v21, %v494_v53 }
  0xe5   : > { %v561_v56 = vmax.f32 %v495_v54, 0.0 }
  0xe7   : > { %v588_v57 = vpack.c.bf16 %v561_v56, %v560_v55  ;;  %v572_v56 = vmax.f32 %v523_v51, 0.0 }
  0xe9   : > { %696 = vmatmul.bf16.gmra.mxu1 %v588_v57  ;;  %v573_v57 = vmax.f32 %v525_v52, 0.0 }
  0xea   : > { %v497_v58 = vpop.f32.mrf.mxu0 }
  0xeb   : > { %v498_v60 = vadd.f32 %v2243_v21, %v497_v58 }
  0xed   : > { %v562_v63 = vmax.f32 %v498_v60, 0.0  ;;  %v594_v60 = vpack.c.bf16 %v573_v57, %v572_v56 }
  0xf2   : > { %v499_v61 = vpop.f32.mrf.mxu0 }
  0xf3   : > { %v500_v62 = vadd.f32 %v2243_v21, %v499_v61 }
  0xf5   : > { %v563_v0 = vmax.f32 %v500_v62, 0.0 }
  0xf7   : > { %v589_v1 = vpack.c.bf16 %v563_v0, %v562_v63 }
  0xf9   : > { %701 = vmatmul.bf16.gmra.mxu1 %v589_v1 }
  0xfa   : > { %v502_v2 = vpop.f32.mrf.mxu0 }
  0xfb   : > { %v503_v3 = vadd.f32 %v2243_v21, %v502_v2 }
  0xfd   : > { %v564_v6 = vmax.f32 %v503_v3, 0.0 }
 0x102   : > { %v504_v4 = vpop.f32.mrf.mxu0 }
 0x103   : > { %v505_v5 = vadd.f32 %v2243_v21, %v504_v4 }
 0x105   : > { %v565_v7 = vmax.f32 %v505_v5, 0.0 }
 0x107   : > { %v590_v8 = vpack.c.bf16 %v565_v7, %v564_v6 }
 0x109   : > { %706 = vmatmul.bf16.gmra.mxu1 %v590_v8 }
 0x10a   : > { %v507_v9 = vpop.f32.mrf.mxu0 }
 0x10b   : > { %v508_v10 = vadd.f32 %v2243_v21, %v507_v9  ;;  %v1958_v9 = vld [vmem:[%s2195_s22 + $0x70] sm:$0xff] }
 0x10c   : > { %1906 = vmatmul.msk.bf16.gmra.mxu3 %vm414_vm0, %v1958_v9 }
 0x10d   : > { %v566_v13 = vmax.f32 %v508_v10, 0.0 }
 0x112   : > { %v509_v11 = vpop.f32.mrf.mxu0 }
 0x113   : > { %v510_v12 = vadd.f32 %v2243_v21, %v509_v11 }
 0x115   : > { %v567_v14 = vmax.f32 %v510_v12, 0.0 }
 0x117   : > { %v591_v15 = vpack.c.bf16 %v567_v14, %v566_v13 }
 0x119   : > { %711 = vmatmul.bf16.gmra.mxu1 %v591_v15  ;;  %v527_v15 = vpop.f32.mrf.mxu3 }
 0x11a   : > { %v512_v16 = vpop.f32.mrf.mxu0  ;;  %v528_v19 = vadd.f32 %v2243_v21, %v527_v15 }
 0x11b   : > { %v513_v18 = vadd.f32 %v2243_v21, %v512_v16 }
 0x11c   : > { %v574_v27 = vmax.f32 %v528_v19, 0.0 }
 0x11d   : > { %v568_v24 = vmax.f32 %v513_v18, 0.0 }
 0x122   : > { %v514_v20 = vpop.f32.mrf.mxu0 }
 0x123   : > { %v515_v22 = vadd.f32 %v2243_v21, %v514_v20 }
 0x125   : > { %v569_v25 = vmax.f32 %v515_v22, 0.0 }
 0x126   : > { %v677_v26 = vpop.f32.mrf.mxu1 }
 0x127   : > { %v678_v28 = vadd.f32 %v2274_v23, %v677_v26  ;;  %v592_v29 = vpack.c.bf16 %v569_v25, %v568_v24  ;;  %v1959_v24 = vld [vmem:[%s2195_s22 + $0x78] sm:$0xff]  ;;  %v529_v25 = vpop.f32.mrf.mxu3  ;;  %s922_s22 = sld [smem:[#allocation2]] }
 0x128   : > { %1907 = vmatmul.msk.bf16.gmra.mxu3 %vm414_vm0, %v1959_v24  ;;  %vm1696_vm0 = vcmask 1048512  }
 0x129   : > { %v757_v31 = vmax.f32 %v678_v28, 0.0  ;;  %716 = vmatmul.bf16.vlgmr.msra.gmra.mxu2 %v592_v29  ;;  %v530_v28 = vadd.f32 %v2243_v21, %v529_v25 }
 0x12b   : > { %v793_v32 = vmul.f32 %v2281_v30, %v757_v31  ;;  %v575_v31 = vmax.f32 %v530_v28, 0.0 }
 0x12d   : > { %v826_v33 = vsel %vm825_vm1, %v793_v32, 0.0  ;;  %v2340_v9 = vstv %s922_s22  ;;  %s1739_s22 = scalar_lea.sflag [#allocation4], %s271_s23 }
 0x12e   : > { %v679_v36 = vpop.f32.mrf.mxu1  ;;  %827 = vadd.xlane.f32.xlu0 %v826_v33  ;;  %v595_v33 = vpack.c.bf16 %v575_v31, %v574_v27 }
 0x12f   : > { %v680_v37 = vadd.f32 %v2274_v23, %v679_v36  ;;  %v532_v36 = vpop.f32.mrf.mxu3 }
 0x130   : > { %v533_v40 = vadd.f32 %v2243_v21, %v532_v36 }
 0x131   : > { %v758_v39 = vmax.f32 %v680_v37, 0.0 }
 0x133   : > { %v794_v42 = vmul.f32 %v2281_v30, %v758_v39 }
 0x135   : > { %v829_v43 = vsel %vm825_vm1, %v794_v42, 0.0 }
 0x136   : > { %v682_v45 = vpop.f32.mrf.mxu1  ;;  %830 = vadd.xlane.f32.xlu0 %v829_v43 }
 0x137   : > { %v683_v46 = vadd.f32 %v2274_v23, %v682_v45  ;;  %v534_v43 = vpop.f32.mrf.mxu3  ;;  %v576_v45 = vmax.f32 %v533_v40, 0.0 }
 0x139   : > { %v759_v47 = vmax.f32 %v683_v46, 0.0  ;;  %721 = vmatmul.bf16.gmra.mxu2 %v593_v44  ;;  %v535_v46 = vadd.f32 %v2243_v21, %v534_v43 }
 0x13b   : > { %v795_v49 = vmul.f32 %v2281_v30, %v759_v47  ;;  %v577_v48 = vmax.f32 %v535_v46, 0.0 }
 0x13d   : > { %v832_v50 = vsel %vm825_vm1, %v795_v49, 0.0 }
 0x13e   : > { %v684_v53 = vpop.f32.mrf.mxu1  ;;  %833 = vadd.xlane.f32.xlu1 %v832_v50  ;;  %v596_v50 = vpack.c.bf16 %v577_v48, %v576_v45 }
 0x13f   : > { %v685_v54 = vadd.f32 %v2274_v23, %v684_v53 }
 0x141   : > { %v760_v55 = vmax.f32 %v685_v54, 0.0 }
 0x143   : > { %v796_v58 = vmul.f32 %v2281_v30, %v760_v55 }
 0x145   : > { %v835_v59 = vsel %vm825_vm1, %v796_v58, 0.0 }
 0x146   : > { %v687_v61 = vpop.f32.mrf.mxu1  ;;  %836 = vadd.xlane.f32.xlu1 %v835_v59 }
 0x147   : > { %v688_v62 = vadd.f32 %v2274_v23, %v687_v61 }
 0x149   : > { %v761_v63 = vmax.f32 %v688_v62, 0.0  ;;  %726 = vmatmul.bf16.gmra.mxu2 %v594_v60 }
 0x14b   : > { %v797_v0 = vmul.f32 %v2281_v30, %v761_v63 }
 0x14d   : > { %v838_v1 = vsel %vm825_vm1, %v797_v0, 0.0 }
 0x14e   : > { %v689_v2 = vpop.f32.mrf.mxu1  ;;  %839 = vadd.xlane.f32.xlu2 %v838_v1 }
 0x14f   : > { %v690_v3 = vadd.f32 %v2274_v23, %v689_v2 }
 0x151   : > { %v762_v4 = vmax.f32 %v690_v3, 0.0 }
 0x153   : > { %v798_v5 = vmul.f32 %v2281_v30, %v762_v4 }
 0x155   : > { %v841_v6 = vsel %vm825_vm1, %v798_v5, 0.0 }
 0x156   : > { %v692_v7 = vpop.f32.mrf.mxu1  ;;  %842 = vadd.xlane.f32.xlu2 %v841_v6 }
 0x157   : > { %v693_v8 = vadd.f32 %v2274_v23, %v692_v7 }
 0x159   : > { %v763_v10 = vmax.f32 %v693_v8, 0.0  ;;  %731 = vmatmul.bf16.gmra.mxu2 %v595_v33 }
 0x15b   : > { %v799_v11 = vmul.f32 %v2281_v30, %v763_v10 }
 0x15d   : > { %v844_v12 = vsel %vm825_vm1, %v799_v11, 0.0 }
 0x15e   : > { %v694_v13 = vpop.f32.mrf.mxu1  ;;  %845 = vadd.xlane.f32.xlu0 %v844_v12 }
 0x15f   : > { %v695_v14 = vadd.f32 %v2274_v23, %v694_v13 }
 0x161   : > { %v764_v16 = vmax.f32 %v695_v14, 0.0 }
 0x163   : > { %v800_v17 = vmul.f32 %v2281_v30, %v764_v16 }
 0x165   : > { %v847_v18 = vsel %vm825_vm1, %v800_v17, 0.0 }
 0x166   : > { %v697_v20 = vpop.f32.mrf.mxu1  ;;  %848 = vadd.xlane.f32.xlu1 %v847_v18 }
 0x167   : > { %v698_v22 = vadd.f32 %v2274_v23, %v697_v20 }
 0x169   : > { %v765_v26 = vmax.f32 %v698_v22, 0.0  ;;  %736 = vmatmul.bf16.gmra.mxu2 %v596_v50 }
 0x16b   : > { %v801_v29 = vmul.f32 %v2281_v30, %v765_v26  ;;  %v2093_v26 = vmov 0  }
 0x16c   : > { %2020 = vset.pattern.permute.xlu2 %v2093_v26  ;;  %2021 = vset.pattern.permute.xlu0 %v2093_v26 }
 0x16d   : > { %v850_v32 = vsel %vm825_vm1, %v801_v29, 0.0  ;;  %2022 = vset.pattern.permute.xlu1 %v2093_v26 }
 0x16e   : > { %v699_v34 = vpop.f32.mrf.mxu1  ;;  %851 = vadd.xlane.f32.xlu2 %v850_v32 }
 0x16f   : > { %v700_v35 = vadd.f32 %v2274_v23, %v699_v34 }
 0x171   : > { %v766_v37 = vmax.f32 %v700_v35, 0.0 }
 0x173   : > { %v802_v38 = vmul.f32 %v2281_v30, %v766_v37 }
 0x175   : > { %v853_v39 = vsel %vm825_vm1, %v802_v38, 0.0 }
 0x176   : > { %v702_v41 = vpop.f32.mrf.mxu1  ;;  %854 = vadd.xlane.f32.xlu0 %v853_v39 }
 0x177   : > { %v703_v42 = vadd.f32 %v2274_v23, %v702_v41 }
 0x179   : > { %v767_v44 = vmax.f32 %v703_v42, 0.0 }
 0x17b   : > { %v803_v47 = vmul.f32 %v2281_v30, %v767_v44 }
 0x17d   : > { %v856_v49 = vsel %vm825_vm1, %v803_v47, 0.0 }
 0x17e   : > { %v704_v51 = vpop.f32.mrf.mxu1  ;;  %857 = vadd.xlane.f32.xlu1 %v856_v49 }
 0x17f   : > { %v705_v52 = vadd.f32 %v2274_v23, %v704_v51 }
 0x181   : > { %v768_v53 = vmax.f32 %v705_v52, 0.0 }
 0x183   : > { %v804_v54 = vmul.f32 %v2281_v30, %v768_v53 }
 0x185   : > { %v859_v55 = vsel %vm825_vm1, %v804_v54, 0.0 }
 0x186   : > { %v707_v56 = vpop.f32.mrf.mxu1  ;;  %860 = vadd.xlane.f32.xlu2 %v859_v55 }
 0x187   : > { %v708_v57 = vadd.f32 %v2274_v23, %v707_v56 }
 0x189   : > { %v769_v58 = vmax.f32 %v708_v57, 0.0 }
 0x18b   : > { %v805_v59 = vmul.f32 %v2281_v30, %v769_v58  ;;  %v537_v58 = vpop.f32.mrf.mxu3 }
 0x18d   : > { %v862_v60 = vsel %vm825_vm1, %v805_v59, 0.0 }
 0x18e   : > { %v709_v61 = vpop.f32.mrf.mxu1  ;;  %863 = vadd.xlane.f32.xlu0 %v862_v60 }
 0x18f   : > { %v710_v62 = vadd.f32 %v2274_v23, %v709_v61 }
 0x191   : > { %v770_v63 = vmax.f32 %v710_v62, 0.0 }
 0x193   : > { %v806_v0 = vmul.f32 %v2281_v30, %v770_v63 }
 0x195   : > { %v865_v1 = vsel %vm825_vm1, %v806_v0, 0.0 }
 0x196   : > { %v712_v2 = vpop.f32.mrf.mxu1  ;;  %866 = vadd.xlane.f32.xlu1 %v865_v1 }
 0x197   : > { %v713_v3 = vadd.f32 %v2274_v23, %v712_v2 }
 0x199   : > { %v771_v4 = vmax.f32 %v713_v3, 0.0 }
 0x19b   : > { %v807_v5 = vmul.f32 %v2281_v30, %v771_v4 }
 0x19d   : > { %v868_v6 = vsel %vm825_vm1, %v807_v5, 0.0 }
 0x19e   : > { %v714_v7 = vpop.f32.mrf.mxu1  ;;  %869 = vadd.xlane.f32.xlu2 %v868_v6  ;;  %v539_v6 = vpop.f32.mrf.mxu3 }
 0x19f   : > { %v715_v8 = vadd.f32 %v2274_v23, %v714_v7 }
 0x1a1   : > { %v772_v10 = vmax.f32 %v715_v8, 0.0  ;;  %v828_v11 = vpop.xlane.xlu0 %827 }
 0x1a2   : > { %v924_v12 = vadd.f32 %v2340_v9, %v828_v11  ;;  %v540_v11 = vadd.f32 %v2243_v21, %v539_v6 }
 0x1a3   : > { %v808_v13 = vmul.f32 %v2281_v30, %v772_v10  ;;  %v538_v10 = vadd.f32 %v2243_v21, %v537_v58 }
 0x1a4   : > { %v988_v14 = vperm.slane %v924_v12, 0  ;;  %v989_v15 = vperm.slane %v924_v12, 1  ;;  %v990_v16 = vperm.slane %v924_v12, 2  ;;  %v991_v17 = vperm.slane %v924_v12, 3 }
 0x1a5   : > { %v992_v18 = vperm.slane %v924_v12, 4  ;;  %v871_v19 = vsel %vm825_vm1, %v808_v13, 0.0  ;;  %v993_v20 = vperm.slane %v924_v12, 5  ;;  %v994_v22 = vperm.slane %v924_v12, 6 }
 0x1a6   : > { %1244 = vst [vmem:[#allocation1] ss:$9 sm:$0xff] %v988_v14  ;;  %872 = vadd.xlane.f32.xlu0 %v871_v19  ;;  %v995_v24 = vperm.slane %v924_v12, 7 }
 0x1a7   : > { %1246 = vst [vmem:[#allocation1 + $0x1] ss:$9 sm:$0xff] %v989_v15 }
 0x1a8   : > { %1248 = vst [vmem:[#allocation1 + $0x2] ss:$9 sm:$0xff] %v990_v16  ;;  %v578_v16 = vmax.f32 %v538_v10, 0.0 }
 0x1a9   : > { %1250 = vst [vmem:[#allocation1 + $0x3] ss:$9 sm:$0xff] %v991_v17  ;;  %v831_v25 = vpop.xlane.xlu0 %830  ;;  %v579_v17 = vmax.f32 %v540_v11, 0.0 }
 0x1aa   : > { %1252 = vst [vmem:[#allocation1 + $0x4] ss:$9 sm:$0xff] %v992_v18  ;;  %v925_v28 = vadd.f32 %v2340_v9, %v831_v25 }
 0x1ab   : > { %1254 = vst [vmem:[#allocation1 + $0x5] ss:$9 sm:$0xff] %v993_v20  ;;  %v597_v25 = vpack.c.bf16 %v579_v17, %v578_v16 }
 0x1ac   : > { %1256 = vst [vmem:[#allocation1 + $0x6] ss:$9 sm:$0xff] %v994_v22  ;;  %v717_v27 = vpop.f32.mrf.mxu2  ;;  %v996_v32 = vperm.slane %v925_v28, 0  ;;  %v997_v33 = vperm.slane %v925_v28, 1  ;;  %v998_v35 = vperm.slane %v925_v28, 2  ;;  %v999_v37 = vperm.slane %v925_v28, 3 }
 0x1ad   : > { %1258 = vst [vmem:[#allocation1 + $0x7] ss:$9 sm:$0xff] %v995_v24  ;;  %v718_v29 = vadd.f32 %v2274_v23, %v717_v27  ;;  %v1000_v38 = vperm.slane %v925_v28, 4  ;;  %v1001_v39 = vperm.slane %v925_v28, 5  ;;  %v1002_v41 = vperm.slane %v925_v28, 6  ;;  %741 = vmatmul.bf16.gmra.mxu2 %v597_v25 }
 0x1ae   : > { %v1003_v42 = vperm.slane %v925_v28, 7 }
 0x1af   : > { %v773_v31 = vmax.f32 %v718_v29, 0.0 }
 0x1b1   : > { %v809_v34 = vmul.f32 %v2281_v30, %v773_v31  ;;  %v834_v43 = vpop.xlane.xlu1 %833 }
 0x1b2   : > { %v926_v44 = vadd.f32 %v2340_v9, %v834_v43 }
 0x1b3   : > { %v874_v40 = vsel %vm825_vm1, %v809_v34, 0.0 }
 0x1b4   : > { %v1259_v36 = vld [vmem:[#allocation1] sm:$0xff]  ;;  %875 = vadd.xlane.f32.xlu1 %v874_v40  ;;  %v1004_v45 = vperm.slane %v926_v44, 0  ;;  %v1005_v46 = vperm.slane %v926_v44, 1  ;;  %v1006_v47 = vperm.slane %v926_v44, 2  ;;  %v1007_v49 = vperm.slane %v926_v44, 3  ;;  %v719_v56 = vpop.f32.mrf.mxu2 }
 0x1b5   : > { %1260 = vst [vmem:[#allocation1] ss:$9 sm:$0xff] %v996_v32  ;;  %v1008_v50 = vperm.slane %v926_v44, 4  ;;  %v1009_v51 = vperm.slane %v926_v44, 5  ;;  %v1010_v52 = vperm.slane %v926_v44, 6  ;;  %v1011_v53 = vperm.slane %v926_v44, 7 }
 0x1b6   : > { %1261 = vst [vmem:[#allocation1 + $0x1] ss:$9 sm:$0xff] %v997_v33  ;;  %1540 = vperm.xlu2 %2020, %v1259_v36   ;;  %v720_v62 = vadd.f32 %v2274_v23, %v719_v56 }
 0x1b7   : > { %1262 = vst [vmem:[#allocation1 + $0x2] ss:$9 sm:$0xff] %v998_v35 }
 0x1b8   : > { %1263 = vst [vmem:[#allocation1 + $0x3] ss:$9 sm:$0xff] %v999_v37  ;;  %v774_v3 = vmax.f32 %v720_v62, 0.0 }
 0x1b9   : > { %1264 = vst [vmem:[#allocation1 + $0x4] ss:$9 sm:$0xff] %v1000_v38  ;;  %v837_v54 = vpop.xlane.xlu1 %836 }
 0x1ba   : > { %1265 = vst [vmem:[#allocation1 + $0x5] ss:$9 sm:$0xff] %v1001_v39  ;;  %v927_v55 = vadd.f32 %v2340_v9, %v837_v54  ;;  %v810_v8 = vmul.f32 %v2281_v30, %v774_v3 }
 0x1bb   : > { %1266 = vst [vmem:[#allocation1 + $0x6] ss:$9 sm:$0xff] %v1002_v41 }
 0x1bc   : > { %1267 = vst [vmem:[#allocation1 + $0x7] ss:$9 sm:$0xff] %v1003_v42  ;;  %v1012_v57 = vperm.slane %v927_v55, 0  ;;  %v1013_v59 = vperm.slane %v927_v55, 1  ;;  %v1014_v60 = vperm.slane %v927_v55, 2  ;;  %v1015_v63 = vperm.slane %v927_v55, 3  ;;  %v722_v28 = vpop.f32.mrf.mxu2 }
 0x1bd   : > { %v1016_v0 = vperm.slane %v927_v55, 4  ;;  %v1017_v1 = vperm.slane %v927_v55, 5  ;;  %v1018_v2 = vperm.slane %v927_v55, 6  ;;  %v1019_v4 = vperm.slane %v927_v55, 7 }
 0x1be   : > { %v877_v13 = vsel %vm825_vm1, %v810_v8, 0.0  ;;  %v723_v42 = vadd.f32 %v2274_v23, %v722_v28 }
 0x1c1   : > { %v840_v5 = vpop.xlane.xlu2 %839 }
 0x1c2   : > { %v928_v7 = vadd.f32 %v2340_v9, %v840_v5 }
 0x1c3   : > { %v1268_v48 = vld [vmem:[#allocation1] sm:$0xff] }
 0x1c4   : > { %1269 = vst [vmem:[#allocation1] ss:$9 sm:$0xff] %v1004_v45  ;;  %1543 = vperm.xlu0 %2021, %v1268_v48   ;;  %v1020_v12 = vperm.slane %v928_v7, 0  ;;  %v1021_v14 = vperm.slane %v928_v7, 1  ;;  %v1022_v15 = vperm.slane %v928_v7, 2  ;;  %v1023_v19 = vperm.slane %v928_v7, 3  ;;  %v724_v36 = vpop.f32.mrf.mxu2 }
 0x1c5   : > { %1270 = vst [vmem:[#allocation1 + $0x1] ss:$9 sm:$0xff] %v1005_v46  ;;  %v1024_v20 = vperm.slane %v928_v7, 4  ;;  %v1025_v22 = vperm.slane %v928_v7, 5  ;;  %v1026_v24 = vperm.slane %v928_v7, 6  ;;  %v1027_v26 = vperm.slane %v928_v7, 7 }
 0x1c6   : > { %1271 = vst [vmem:[#allocation1 + $0x2] ss:$9 sm:$0xff] %v1006_v47  ;;  %v775_v45 = vmax.f32 %v723_v42, 0.0 }
 0x1c7   : > { %1272 = vst [vmem:[#allocation1 + $0x3] ss:$9 sm:$0xff] %v1007_v49 }
 0x1c8   : > { %1273 = vst [vmem:[#allocation1 + $0x4] ss:$9 sm:$0xff] %v1008_v50 }
 0x1c9   : > { %1274 = vst [vmem:[#allocation1 + $0x5] ss:$9 sm:$0xff] %v1009_v51  ;;  %v843_v27 = vpop.xlane.xlu2 %842 }
 0x1ca   : > { %1275 = vst [vmem:[#allocation1 + $0x6] ss:$9 sm:$0xff] %v1010_v52  ;;  %v929_v29 = vadd.f32 %v2340_v9, %v843_v27  ;;  %v811_v52 = vmul.f32 %v2281_v30, %v775_v45 }
 0x1cb   : > { %1276 = vst [vmem:[#allocation1 + $0x7] ss:$9 sm:$0xff] %v1011_v53 }
 0x1cc   : > { %v1028_v31 = vperm.slane %v929_v29, 0  ;;  %v1029_v32 = vperm.slane %v929_v29, 1  ;;  %v1030_v33 = vperm.slane %v929_v29, 2  ;;  %v1031_v35 = vperm.slane %v929_v29, 3  ;;  %v2360_v44 = vpop.f32.mrf.mxu2 }
 0x1cd   : > { %v1032_v37 = vperm.slane %v929_v29, 4  ;;  %v1033_v38 = vperm.slane %v929_v29, 5  ;;  %v1034_v39 = vperm.slane %v929_v29, 6  ;;  %v1035_v40 = vperm.slane %v929_v29, 7 }
 0x1ce   : > { %v880_v55 = vsel %vm825_vm1, %v811_v52, 0.0 }
 0x1d1   : > { %v846_v41 = vpop.xlane.xlu0 %845 }
 0x1d2   : > { %v1277_v61 = vld [vmem:[#allocation1] sm:$0xff]  ;;  %v930_v43 = vadd.f32 %v2340_v9, %v846_v41  ;;  %v542_v41 = vpop.f32.mrf.mxu3 }
 0x1d3   : > { %1278 = vst [vmem:[#allocation1] ss:$9 sm:$0xff] %v1012_v57  ;;  %1546 = vperm.xlu1 %2022, %v1277_v61   ;;  %v725_v61 = vadd.f32 %v2274_v23, %v724_v36 }
 0x1d4   : > { %1279 = vst [vmem:[#allocation1 + $0x1] ss:$9 sm:$0xff] %v1013_v59  ;;  %v1036_v46 = vperm.slane %v930_v43, 0  ;;  %v1037_v47 = vperm.slane %v930_v43, 1  ;;  %v1038_v48 = vperm.slane %v930_v43, 2  ;;  %v1039_v50 = vperm.slane %v930_v43, 3  ;;  %v729_v58 = vpop.f32.mrf.mxu2 }
 0x1d5   : > { %1280 = vst [vmem:[#allocation1 + $0x2] ss:$9 sm:$0xff] %v1014_v60  ;;  %v1040_v51 = vperm.slane %v930_v43, 4  ;;  %v1041_v53 = vperm.slane %v930_v43, 5  ;;  %v1042_v54 = vperm.slane %v930_v43, 6  ;;  %v1043_v56 = vperm.slane %v930_v43, 7 }
 0x1d6   : > { %1281 = vst [vmem:[#allocation1 + $0x3] ss:$9 sm:$0xff] %v1015_v63  ;;  %v730_v60 = vadd.f32 %v2274_v23, %v729_v58 }
 0x1d7   : > { %1282 = vst [vmem:[#allocation1 + $0x4] ss:$9 sm:$0xff] %v1016_v0 }
 0x1d8   : > { %1283 = vst [vmem:[#allocation1 + $0x5] ss:$9 sm:$0xff] %v1017_v1  ;;  %v778_v63 = vmax.f32 %v730_v60, 0.0  ;;  %v776_v1 = vmax.f32 %v725_v61, 0.0 }
 0x1d9   : > { %1284 = vst [vmem:[#allocation1 + $0x6] ss:$9 sm:$0xff] %v1018_v2  ;;  %v849_v57 = vpop.xlane.xlu1 %848 }
 0x1da   : > { %1285 = vst [vmem:[#allocation1 + $0x7] ss:$9 sm:$0xff] %v1019_v4  ;;  %v931_v59 = vadd.f32 %v2340_v9, %v849_v57  ;;  %v814_v6 = vmul.f32 %v2281_v30, %v778_v63  ;;  %v812_v11 = vmul.f32 %v2281_v30, %v776_v1 }
 0x1dc   : > { %v1044_v62 = vperm.slane %v931_v59, 0  ;;  %v1045_v0 = vperm.slane %v931_v59, 1  ;;  %v1046_v2 = vperm.slane %v931_v59, 2  ;;  %v1047_v4 = vperm.slane %v931_v59, 3 }
 0x1dd   : > { %v1048_v5 = vperm.slane %v931_v59, 4  ;;  %v1049_v7 = vperm.slane %v931_v59, 5  ;;  %v1050_v8 = vperm.slane %v931_v59, 6  ;;  %v889_v10 = vsel %vm825_vm1, %v814_v6, 0.0 }
 0x1df   : > { %878 = vadd.xlane.f32.xlu2 %v877_v13 }
 0x1e1   : > { %v1286_v18 = vld [vmem:[#allocation1] sm:$0xff]  ;;  %v852_v13 = vpop.xlane.xlu2 %851 }
 0x1e2   : > { %1287 = vst [vmem:[#allocation1] ss:$9 sm:$0xff] %v1020_v12  ;;  %v1051_v12 = vperm.slane %v931_v59, 7 }
 0x1e3   : > { %1288 = vst [vmem:[#allocation1 + $0x1] ss:$9 sm:$0xff] %v1021_v14  ;;  %v883_v14 = vsel %vm825_vm1, %v812_v11, 0.0 }
 0x1e4   : > { %1289 = vst [vmem:[#allocation1 + $0x2] ss:$9 sm:$0xff] %v1022_v15  ;;  %v932_v15 = vadd.f32 %v2340_v9, %v852_v13 }
 0x1e5   : > { %1290 = vst [vmem:[#allocation1 + $0x3] ss:$9 sm:$0xff] %v1023_v19 }
 0x1e6   : > { %1291 = vst [vmem:[#allocation1 + $0x4] ss:$9 sm:$0xff] %v1024_v20  ;;  %v1052_v16 = vperm.slane %v932_v15, 0  ;;  %v1053_v17 = vperm.slane %v932_v15, 1  ;;  %v1055_v20 = vperm.slane %v932_v15, 3  ;;  %v1058_v25 = vperm.slane %v932_v15, 6 }
 0x1e7   : > { %1292 = vst [vmem:[#allocation1 + $0x5] ss:$9 sm:$0xff] %v1025_v22  ;;  %v1056_v22 = vperm.slane %v932_v15, 4 }
 0x1e8   : > { %1293 = vst [vmem:[#allocation1 + $0x6] ss:$9 sm:$0xff] %v1026_v24  ;;  %v1057_v24 = vperm.slane %v932_v15, 5 }
 0x1e9   : > { %1294 = vst [vmem:[#allocation1 + $0x7] ss:$9 sm:$0xff] %v1027_v26  ;;  %v1059_v26 = vperm.slane %v932_v15, 7  ;;  %v855_v27 = vpop.xlane.xlu0 %854 }
 0x1ea   : > { %v933_v28 = vadd.f32 %v2340_v9, %v855_v27 }
 0x1ec   : > { %v1060_v29 = vperm.slane %v933_v28, 0  ;;  %v1065_v36 = vperm.slane %v933_v28, 5 }
 0x1ee   : > { %881 = vadd.xlane.f32.xlu0 %v880_v55  ;;  %v543_v55 = vadd.f32 %v2243_v21, %v542_v41 }
 0x1f0   : > { %v1295_v34 = vld [vmem:[#allocation1] sm:$0xff]  ;;  %v580_v58 = vmax.f32 %v543_v55, 0.0  ;;  %v1635_v55 = vlaneseq }
 0x1f1   : > { %1296 = vst [vmem:[#allocation1] ss:$9 sm:$0xff] %v1028_v31  ;;  %v1061_v31 = vperm.slane %v933_v28, 1 }
 0x1f2   : > { %1297 = vst [vmem:[#allocation1 + $0x1] ss:$9 sm:$0xff] %v1029_v32  ;;  %v1062_v32 = vperm.slane %v933_v28, 2 }
 0x1f3   : > { %1298 = vst [vmem:[#allocation1 + $0x2] ss:$9 sm:$0xff] %v1030_v33 }
 0x1f4   : > { %1299 = vst [vmem:[#allocation1 + $0x3] ss:$9 sm:$0xff] %v1031_v35  ;;  %v1064_v35 = vperm.slane %v933_v28, 4 }
 0x1f5   : > { %1300 = vst [vmem:[#allocation1 + $0x4] ss:$9 sm:$0xff] %v1032_v37  ;;  %v1066_v37 = vperm.slane %v933_v28, 6 }
 0x1f6   : > { %1301 = vst [vmem:[#allocation1 + $0x5] ss:$9 sm:$0xff] %v1033_v38  ;;  %890 = vadd.xlane.f32.xlu0 %v889_v10  ;;  %v1067_v38 = vperm.slane %v933_v28, 7 }
 0x1f7   : > { %1302 = vst [vmem:[#allocation1 + $0x6] ss:$9 sm:$0xff] %v1034_v39  ;;  %1549 = vperm.xlu2 %2020, %v1286_v18   ;;  %v1054_v18 = vperm.slane %v932_v15, 2  ;;  %v858_v39 = vpop.xlane.xlu1 %857 }
 0x1f8   : > { %1303 = vst [vmem:[#allocation1 + $0x7] ss:$9 sm:$0xff] %v1035_v40  ;;  %v934_v40 = vadd.f32 %v2340_v9, %v858_v39 }
 0x1f9   : > { %v861_v52 = vpop.xlane.xlu2 %860 }
 0x1fa   : > { %v1068_v42 = vperm.slane %v934_v40, 0  ;;  %v1069_v43 = vperm.slane %v934_v40, 1  ;;  %v1070_v45 = vperm.slane %v934_v40, 2 }
 0x1fd   : > { %884 = vadd.xlane.f32.xlu1 %v883_v14 }
 0x1ff   : > { %v2362_v49 = vld [vmem:[#allocation1] sm:$0xff]  ;;  %1552 = vperm.xlu2 %2020, %v1295_v34   ;;  %v1063_v34 = vperm.slane %v933_v28, 3 }
 0x200   : > { %1305 = vst [vmem:[#allocation1] ss:$9 sm:$0xff] %v1036_v46 }
 0x201   : > { %1306 = vst [vmem:[#allocation1 + $0x1] ss:$9 sm:$0xff] %v1037_v47  ;;  %v1071_v47 = vperm.slane %v934_v40, 3 }
 0x202   : > { %1307 = vst [vmem:[#allocation1 + $0x2] ss:$9 sm:$0xff] %v1038_v48  ;;  %v1072_v48 = vperm.slane %v934_v40, 4 }
 0x203   : > { %1308 = vst [vmem:[#allocation1 + $0x3] ss:$9 sm:$0xff] %v1039_v50  ;;  %v1074_v50 = vperm.slane %v934_v40, 6 }
 0x204   : > { %1309 = vst [vmem:[#allocation1 + $0x4] ss:$9 sm:$0xff] %v1040_v51  ;;  %v1075_v51 = vperm.slane %v934_v40, 7 }
 0x205   : > { %1310 = vst [vmem:[#allocation1 + $0x5] ss:$9 sm:$0xff] %v1041_v53  ;;  %v544_v53 = vpop.f32.mrf.mxu3 }
 0x206   : > { %1311 = vst [vmem:[#allocation1 + $0x6] ss:$9 sm:$0xff] %v1042_v54  ;;  %v935_v54 = vadd.f32 %v2340_v9, %v861_v52 }
 0x207   : > { %1312 = vst [vmem:[#allocation1 + $0x7] ss:$9 sm:$0xff] %v1043_v56  ;;  %v545_v56 = vadd.f32 %v2243_v21, %v544_v53  ;;  %v864_v21 = vpop.xlane.xlu0 %863 }
 0x208   : > { %v1076_v57 = vperm.slane %v935_v54, 0  ;;  %v1077_v60 = vperm.slane %v935_v54, 1  ;;  %v1078_v61 = vperm.slane %v935_v54, 2  ;;  %v1079_v63 = vperm.slane %v935_v54, 3 }
 0x209   : > { %v581_v59 = vmax.f32 %v545_v56, 0.0  ;;  %v936_v6 = vadd.f32 %v2340_v9, %v864_v21 }
 0x20b   : > { %v598_v1 = vpack.c.bf16 %v581_v59, %v580_v58  ;;  %v1085_v10 = vperm.slane %v936_v6, 1  ;;  %v1086_v11 = vperm.slane %v936_v6, 2  ;;  %v1087_v13 = vperm.slane %v936_v6, 3 }
 0x20c   : > { %v1088_v14 = vperm.slane %v936_v6, 4  ;;  %v1089_v15 = vperm.slane %v936_v6, 5 }
 0x20d   : > { %746 = vmatmul.bf16.gmra.mxu2 %v598_v1 }
 0x20e   : > { %v2369_v3 = vld [vmem:[#allocation1] sm:$0xff] }
 0x20f   : > { %1314 = vst [vmem:[#allocation1] ss:$9 sm:$0xff] %v1044_v62 }
 0x210   : > { %1315 = vst [vmem:[#allocation1 + $0x1] ss:$9 sm:$0xff] %v1045_v0  ;;  %v1080_v0 = vperm.slane %v935_v54, 4 }
 0x211   : > { %1316 = vst [vmem:[#allocation1 + $0x2] ss:$9 sm:$0xff] %v1046_v2  ;;  %v1081_v2 = vperm.slane %v935_v54, 5 }
 0x212   : > { %1317 = vst [vmem:[#allocation1 + $0x3] ss:$9 sm:$0xff] %v1047_v4  ;;  %v1082_v4 = vperm.slane %v935_v54, 6 }
 0x213   : > { %1318 = vst [vmem:[#allocation1 + $0x4] ss:$9 sm:$0xff] %v1048_v5  ;;  %v1083_v5 = vperm.slane %v935_v54, 7 }
 0x214   : > { %1319 = vst [vmem:[#allocation1 + $0x5] ss:$9 sm:$0xff] %v1049_v7  ;;  %v547_v7 = vpop.f32.mrf.mxu3 }
 0x215   : > { %1320 = vst [vmem:[#allocation1 + $0x6] ss:$9 sm:$0xff] %v1050_v8  ;;  %v1084_v8 = vperm.slane %v936_v6, 0 }
 0x216   : > { %1321 = vst [vmem:[#allocation1 + $0x7] ss:$9 sm:$0xff] %v1051_v12  ;;  %1555 = vperm.xlu1 %2022, %v2362_v49   ;;  %v1073_v49 = vperm.slane %v934_v40, 5 }
 0x219   : > { %v873_v53 = vpop.xlane.xlu0 %872 }
 0x21d   : > { %v2376_v19 = vld [vmem:[#allocation1] sm:$0xff] }
 0x21e   : > { %1323 = vst [vmem:[#allocation1] ss:$9 sm:$0xff] %v1052_v16  ;;  %v1090_v16 = vperm.slane %v936_v6, 6 }
 0x21f   : > { %1324 = vst [vmem:[#allocation1 + $0x1] ss:$9 sm:$0xff] %v1053_v17  ;;  %v1091_v17 = vperm.slane %v936_v6, 7 }
 0x220   : > { %1325 = vst [vmem:[#allocation1 + $0x2] ss:$9 sm:$0xff] %v1054_v18  ;;  %v867_v18 = vpop.xlane.xlu1 %866 }
 0x221   : > { %1326 = vst [vmem:[#allocation1 + $0x3] ss:$9 sm:$0xff] %v1055_v20  ;;  %v549_v20 = vpop.f32.mrf.mxu3 }
 0x222   : > { %1327 = vst [vmem:[#allocation1 + $0x4] ss:$9 sm:$0xff] %v1056_v22  ;;  %v732_v22 = vpop.f32.mrf.mxu2 }
 0x223   : > { %1328 = vst [vmem:[#allocation1 + $0x5] ss:$9 sm:$0xff] %v1057_v24  ;;  %v937_v24 = vadd.f32 %v2340_v9, %v867_v18 }
 0x224   : > { %1329 = vst [vmem:[#allocation1 + $0x6] ss:$9 sm:$0xff] %v1058_v25  ;;  %v2026_v25 = vld [vmem:[%s2656_s2] ss:$0 sm:$0xff] }
 0x225   : > { %1330 = vst [vmem:[#allocation1 + $0x7] ss:$9 sm:$0xff] %v1059_v26  ;;  %v548_v26 = vadd.f32 %v2026_v25, %v547_v7  ;;  %v550_v27 = vadd.f32 %v2026_v25, %v549_v20  ;;  %v1092_v28 = vperm.slane %v937_v24, 0  ;;  %v1097_v39 = vperm.slane %v937_v24, 5 }
 0x226   : > { %v1098_v41 = vperm.slane %v937_v24, 6 }
 0x228   : > { %v876_v21 = vpop.xlane.xlu1 %875 }
 0x22a   : > { %v2399_v40 = vpop.f32.mrf.mxu2 }
 0x22c   : > { %v1331_v33 = vld [vmem:[#allocation1] sm:$0xff] }
 0x22d   : > { %1332 = vst [vmem:[#allocation1] ss:$9 sm:$0xff] %v1060_v29  ;;  %1564 = vperm.xlu0 %2021, %v1331_v33   ;;  %v582_v29 = vmax.f32 %v548_v26, 0.0  ;;  %v1094_v33 = vperm.slane %v937_v24, 2 }
 0x22e   : > { %1333 = vst [vmem:[#allocation1 + $0x1] ss:$9 sm:$0xff] %v1061_v31  ;;  %v583_v31 = vmax.f32 %v550_v27, 0.0 }
 0x22f   : > { %1334 = vst [vmem:[#allocation1 + $0x2] ss:$9 sm:$0xff] %v1062_v32  ;;  %v1093_v32 = vperm.slane %v937_v24, 1 }
 0x230   : > { %1335 = vst [vmem:[#allocation1 + $0x3] ss:$9 sm:$0xff] %v1063_v34  ;;  %v728_v34 = vadd.f32 %v2274_v23, %v2360_v44 }
 0x231   : > { %1336 = vst [vmem:[#allocation1 + $0x4] ss:$9 sm:$0xff] %v1064_v35 }
 0x232   : > { %1337 = vst [vmem:[#allocation1 + $0x5] ss:$9 sm:$0xff] %v1065_v36  ;;  %v1095_v36 = vperm.slane %v937_v24, 3 }
 0x233   : > { %1338 = vst [vmem:[#allocation1 + $0x6] ss:$9 sm:$0xff] %v1066_v37  ;;  %v1096_v37 = vperm.slane %v937_v24, 4 }
 0x234   : > { %1339 = vst [vmem:[#allocation1 + $0x7] ss:$9 sm:$0xff] %v1067_v38  ;;  %v599_v38 = vpack.c.bf16 %v583_v31, %v582_v29 }
 0x236   : > { %751 = vmatmul.bf16.gmra.mxu2 %v599_v38 }
 0x23b   : > { %v2381_v46 = vld [vmem:[#allocation1] sm:$0xff] }
 0x23c   : > { %1341 = vst [vmem:[#allocation1] ss:$9 sm:$0xff] %v1068_v42  ;;  %v777_v42 = vmax.f32 %v728_v34, 0.0 }
 0x23d   : > { %1342 = vst [vmem:[#allocation1 + $0x1] ss:$9 sm:$0xff] %v1069_v43  ;;  %v1099_v43 = vperm.slane %v937_v24, 7 }
 0x23e   : > { %1343 = vst [vmem:[#allocation1 + $0x2] ss:$9 sm:$0xff] %v1070_v45  ;;  %v870_v45 = vpop.xlane.xlu2 %869 }
 0x23f   : > { %1344 = vst [vmem:[#allocation1 + $0x3] ss:$9 sm:$0xff] %v1071_v47  ;;  %v938_v44 = vadd.f32 %v2340_v9, %v870_v45  ;;  %v813_v47 = vmul.f32 %v2281_v30, %v777_v42 }
 0x240   : > { %1345 = vst [vmem:[#allocation1 + $0x4] ss:$9 sm:$0xff] %v1072_v48  ;;  %v737_v48 = vpop.f32.mrf.mxu2 }
 0x241   : > { %1346 = vst [vmem:[#allocation1 + $0x5] ss:$9 sm:$0xff] %v1073_v49  ;;  %v886_v49 = vsel %vm825_vm1, %v813_v47, 0.0  ;;  %v1101_v52 = vperm.slane %v938_v44, 1  ;;  %v1102_v54 = vperm.slane %v938_v44, 2  ;;  %v1103_v58 = vperm.slane %v938_v44, 3 }
 0x242   : > { %1347 = vst [vmem:[#allocation1 + $0x6] ss:$9 sm:$0xff] %v1074_v50  ;;  %v738_v50 = vadd.f32 %v2274_v23, %v737_v48  ;;  %887 = vadd.xlane.f32.xlu2 %v886_v49  ;;  %v1104_v59 = vperm.slane %v938_v44, 4 }
 0x243   : > { %1348 = vst [vmem:[#allocation1 + $0x7] ss:$9 sm:$0xff] %v1075_v51  ;;  %v1100_v51 = vperm.slane %v938_v44, 0 }
 0x244   : > { %v781_v56 = vmax.f32 %v738_v50, 0.0 }
 0x245   : > { %v1547_v20 = vpop.permute.xlu1 %1546 }
 0x246   : > { %v817_v1 = vmul.f32 %v2281_v30, %v781_v56 }
 0x248   : > { %v898_v6 = vsel %vm825_vm1, %v817_v1, 0.0 }
 0x24a   : > { %v2386_v62 = vld [vmem:[#allocation1] sm:$0xff] }
 0x24b   : > { %1350 = vst [vmem:[#allocation1] ss:$9 sm:$0xff] %v1076_v57 }
 0x24c   : > { %1351 = vst [vmem:[#allocation1 + $0x1] ss:$9 sm:$0xff] %v1077_v60  ;;  %v733_v60 = vadd.f32 %v2274_v23, %v732_v22  ;;  %v1544_v23 = vpop.permute.xlu0 %1543 }
 0x24d   : > { %1352 = vst [vmem:[#allocation1 + $0x2] ss:$9 sm:$0xff] %v1078_v61  ;;  %v1105_v61 = vperm.slane %v938_v44, 5 }
 0x24e   : > { %1353 = vst [vmem:[#allocation1 + $0x3] ss:$9 sm:$0xff] %v1079_v63  ;;  %v1106_v63 = vperm.slane %v938_v44, 6 }
 0x24f   : > { %1354 = vst [vmem:[#allocation1 + $0x4] ss:$9 sm:$0xff] %v1080_v0  ;;  %v2409_v0 = vand.u32 127, %v1635_v55 }
 0x250   : > { %1355 = vst [vmem:[#allocation1 + $0x5] ss:$9 sm:$0xff] %v1081_v2  ;;  %v1107_v2 = vperm.slane %v938_v44, 7 }
 0x251   : > { %1356 = vst [vmem:[#allocation1 + $0x6] ss:$9 sm:$0xff] %v1082_v4  ;;  %v1541_v4 = vpop.permute.xlu2 %1540  ;;  %v2414_v7 = vadd.s32 4294967288, %v2409_v0  ;;  %v2423_v18 = vadd.s32 4294967280, %v2409_v0 }
 0x252   : > { %1357 = vst [vmem:[#allocation1 + $0x7] ss:$9 sm:$0xff] %v1083_v5  ;;  %v779_v5 = vmax.f32 %v733_v60, 0.0  ;;  %v2452_v60 = vld [vmem:[%s2658_s4] ss:$0 sm:$0xff] }
 0x253   : > { %v1643_v26 = vperm.slane %v1547_v20, %v2423_v18 }
 0x257   : > { %899 = vadd.xlane.f32.xlu0 %v898_v6  ;;  %v2461_v6 = vld [vmem:[%s2659_s5] ss:$0 sm:$0xff] }
 0x259   : > { %v2389_v12 = vld [vmem:[#allocation1] sm:$0xff]  ;;  %v879_v31 = vpop.xlane.xlu2 %878 }
 0x25a   : > { %1359 = vst [vmem:[#allocation1] ss:$9 sm:$0xff] %v1084_v8  ;;  %v1637_v8 = vperm.slane %v1541_v4, %v2409_v0  ;;  %1558 = vperm.xlu2 %2020, %v2369_v3   ;;  %v941_v49 = vadd.f32 %v2340_v9, %v879_v31 }
 0x25b   : > { %1360 = vst [vmem:[#allocation1 + $0x1] ss:$9 sm:$0xff] %v1085_v10  ;;  %v1639_v10 = vperm.slane %v1544_v23, %v2414_v7 }
 0x25c   : > { %1361 = vst [vmem:[#allocation1 + $0x2] ss:$9 sm:$0xff] %v1086_v11  ;;  %v939_v11 = vadd.f32 %v2340_v9, %v873_v53  ;;  %v1126_v53 = vperm.slane %v941_v49, 2  ;;  %v1127_v56 = vperm.slane %v941_v49, 3 }
 0x25d   : > { %1362 = vst [vmem:[#allocation1 + $0x3] ss:$9 sm:$0xff] %v1087_v13  ;;  %v1641_v13 = vsel %vm1640_vm2, %v1639_v10, %v1637_v8 }
 0x25e   : > { %1363 = vst [vmem:[#allocation1 + $0x4] ss:$9 sm:$0xff] %v1088_v14  ;;  %v815_v14 = vmul.f32 %v2281_v30, %v779_v5  ;;  %v1110_v22 = vperm.slane %v939_v11, 2  ;;  %v1111_v25 = vperm.slane %v939_v11, 3  ;;  %v1112_v27 = vperm.slane %v939_v11, 4 }
 0x25f   : > { %1364 = vst [vmem:[#allocation1 + $0x5] ss:$9 sm:$0xff] %v1089_v15  ;;  %v1645_v30 = vsel %vm1644_vm3, %v1643_v26, %v1641_v13  ;;  %v1114_v29 = vperm.slane %v939_v11, 6 }
 0x260   : > { %1365 = vst [vmem:[#allocation1 + $0x6] ss:$9 sm:$0xff] %v1090_v16  ;;  %v892_v15 = vsel %vm825_vm1, %v815_v14, 0.0  ;;  %v1108_v16 = vperm.slane %v939_v11, 0 }
 0x261   : > { %1366 = vst [vmem:[#allocation1 + $0x7] ss:$9 sm:$0xff] %v1091_v17  ;;  %893 = vadd.xlane.f32.xlu1 %v892_v15  ;;  %v1109_v17 = vperm.slane %v939_v11, 1  ;;  %v1550_v38 = vpop.permute.xlu2 %1549  ;;  %v882_v1 = vpop.xlane.xlu0 %881 }
 0x262   : > { %v942_v5 = vadd.f32 %v2340_v9, %v882_v1  ;;  %v2494_v1 = vadd.s32 4294967248, %v2409_v0 }
 0x264   : > { %v1132_v23 = vperm.slane %v942_v5, 0  ;;  %v1133_v10 = vperm.slane %v942_v5, 1  ;;  %v1135_v14 = vperm.slane %v942_v5, 3  ;;  %v1137_v20 = vperm.slane %v942_v5, 5 }
 0x268   : > { %v2397_v35 = vld [vmem:[#allocation1] sm:$0xff] }
 0x269   : > { %1368 = vst [vmem:[#allocation1] ss:$9 sm:$0xff] %v1092_v28  ;;  %v1113_v28 = vperm.slane %v939_v11, 5 }
 0x26a   : > { %1369 = vst [vmem:[#allocation1 + $0x1] ss:$9 sm:$0xff] %v1093_v32  ;;  %v1115_v32 = vperm.slane %v939_v11, 7  ;;  %v1134_v11 = vperm.slane %v942_v5, 2 }
 0x26b   : > { %1370 = vst [vmem:[#allocation1 + $0x2] ss:$9 sm:$0xff] %v1094_v33  ;;  %v940_v33 = vadd.f32 %v2340_v9, %v876_v21  ;;  %1573 = vperm.xlu0 %2021, %v2389_v12  }
 0x26c   : > { %1371 = vst [vmem:[#allocation1 + $0x3] ss:$9 sm:$0xff] %v1095_v36 }
 0x26d   : > { %1372 = vst [vmem:[#allocation1 + $0x4] ss:$9 sm:$0xff] %v1096_v37  ;;  %v1116_v34 = vperm.slane %v940_v33, 0  ;;  %v1117_v36 = vperm.slane %v940_v33, 1  ;;  %v2433_v37 = vadd.s32 4294967272, %v2409_v0  ;;  %v1119_v42 = vperm.slane %v940_v33, 3 }
 0x26e   : > { %1373 = vst [vmem:[#allocation1 + $0x5] ss:$9 sm:$0xff] %v1097_v39  ;;  %v1118_v39 = vperm.slane %v940_v33, 2  ;;  %v1120_v45 = vperm.slane %v940_v33, 4  ;;  %v1121_v44 = vperm.slane %v940_v33, 5  ;;  %v1122_v47 = vperm.slane %v940_v33, 6 }
 0x26f   : > { %1374 = vst [vmem:[#allocation1 + $0x6] ss:$9 sm:$0xff] %v1098_v41  ;;  %v1647_v3 = vperm.slane %v1550_v38, %v2433_v37  ;;  %v1123_v48 = vperm.slane %v940_v33, 7 }
 0x270   : > { %1375 = vst [vmem:[#allocation1 + $0x7] ss:$9 sm:$0xff] %v1099_v43  ;;  %v2437_v43 = vpop.f32.mrf.mxu2 }
 0x271   : > { %v2441_v12 = vsel %vm1648_vm4, %v1647_v3, %v1645_v30 }
 0x277   : > { %v2405_v57 = vld [vmem:[#allocation1] sm:$0xff] }
 0x278   : > { %1377 = vst [vmem:[#allocation1] ss:$9 sm:$0xff] %v1100_v51  ;;  %v2445_v50 = vpop.f32.mrf.mxu2  ;;  %v1124_v51 = vperm.slane %v941_v49, 0 }
 0x279   : > { %1378 = vst [vmem:[#allocation1 + $0x1] ss:$9 sm:$0xff] %v1101_v52  ;;  %v1125_v52 = vperm.slane %v941_v49, 1 }
 0x27a   : > { %1379 = vst [vmem:[#allocation1 + $0x2] ss:$9 sm:$0xff] %v1102_v54  ;;  %1561 = vperm.xlu1 %2022, %v2376_v19   ;;  %v735_v19 = vadd.f32 %v2452_v60, %v2399_v40 }
 0x27b   : > { %1380 = vst [vmem:[#allocation1 + $0x3] ss:$9 sm:$0xff] %v1103_v58  ;;  %v1128_v58 = vperm.slane %v941_v49, 4 }
 0x27c   : > { %1381 = vst [vmem:[#allocation1 + $0x4] ss:$9 sm:$0xff] %v1104_v59  ;;  %v1129_v59 = vperm.slane %v941_v49, 5  ;;  %v780_v4 = vmax.f32 %v735_v19, 0.0 }
 0x27d   : > { %1382 = vst [vmem:[#allocation1 + $0x5] ss:$9 sm:$0xff] %v1105_v61  ;;  %v1130_v61 = vperm.slane %v941_v49, 6 }
 0x27e   : > { %1383 = vst [vmem:[#allocation1 + $0x6] ss:$9 sm:$0xff] %v1106_v63  ;;  %v1131_v63 = vperm.slane %v941_v49, 7  ;;  %v816_v40 = vmul.f32 %v2461_v6, %v780_v4 }
 0x27f   : > { %1384 = vst [vmem:[#allocation1 + $0x7] ss:$9 sm:$0xff] %v1107_v2 }
 0x280   : > { %v744_v2 = vpop.f32.mrf.mxu2  ;;  %v895_v15 = vsel %vm825_vm1, %v816_v40, 0.0 }
 0x281   : > { %v745_v21 = vadd.f32 %v2452_v60, %v744_v2 }
 0x283   : > { %v784_v8 = vmax.f32 %v745_v21, 0.0  ;;  %896 = vadd.xlane.f32.xlu2 %v895_v15 }
 0x286   : > { %v2425_v24 = vld [vmem:[#allocation1] sm:$0xff] }
 0x287   : > { %1386 = vst [vmem:[#allocation1] ss:$9 sm:$0xff] %v1108_v16  ;;  %v1136_v16 = vperm.slane %v942_v5, 4 }
 0x288   : > { %1387 = vst [vmem:[#allocation1 + $0x1] ss:$9 sm:$0xff] %v1109_v17  ;;  %v820_v17 = vmul.f32 %v2461_v6, %v784_v8 }
 0x289   : > { %1388 = vst [vmem:[#allocation1 + $0x2] ss:$9 sm:$0xff] %v1110_v22  ;;  %v1138_v22 = vperm.slane %v942_v5, 6 }
 0x28a   : > { %1389 = vst [vmem:[#allocation1 + $0x3] ss:$9 sm:$0xff] %v1111_v25  ;;  %v1139_v25 = vperm.slane %v942_v5, 7  ;;  %v907_v26 = vsel %vm825_vm1, %v820_v17, 0.0 }
 0x28b   : > { %1390 = vst [vmem:[#allocation1 + $0x4] ss:$9 sm:$0xff] %v1112_v27  ;;  %v885_v27 = vpop.xlane.xlu1 %884 }
 0x28c   : > { %1391 = vst [vmem:[#allocation1 + $0x5] ss:$9 sm:$0xff] %v1113_v28  ;;  %v740_v28 = vadd.f32 %v2452_v60, %v2437_v43  ;;  %v943_v30 = vadd.f32 %v2340_v9, %v885_v27 }
 0x28d   : > { %1392 = vst [vmem:[#allocation1 + $0x6] ss:$9 sm:$0xff] %v1114_v29 }
 0x28e   : > { %1393 = vst [vmem:[#allocation1 + $0x7] ss:$9 sm:$0xff] %v1115_v32  ;;  %v782_v29 = vmax.f32 %v740_v28, 0.0  ;;  %v1140_v31 = vperm.slane %v943_v30, 0  ;;  %v1141_v32 = vperm.slane %v943_v30, 1  ;;  %v1142_v33 = vperm.slane %v943_v30, 2 }
 0x28f   : > { %v1143_v38 = vperm.slane %v943_v30, 3  ;;  %v1146_v43 = vperm.slane %v943_v30, 6 }
 0x295   : > { %v2435_v41 = vld [vmem:[#allocation1] sm:$0xff]  ;;  %908 = vadd.xlane.f32.xlu0 %v907_v26 }
 0x296   : > { %1395 = vst [vmem:[#allocation1] ss:$9 sm:$0xff] %v1116_v34  ;;  %v818_v34 = vmul.f32 %v2461_v6, %v782_v29 }
 0x297   : > { %1396 = vst [vmem:[#allocation1 + $0x1] ss:$9 sm:$0xff] %v1117_v36 }
 0x298   : > { %1397 = vst [vmem:[#allocation1 + $0x2] ss:$9 sm:$0xff] %v1118_v39  ;;  %v1144_v39 = vperm.slane %v943_v30, 4  ;;  %v901_v3 = vsel %vm825_vm1, %v818_v34, 0.0 }
 0x299   : > { %1398 = vst [vmem:[#allocation1 + $0x3] ss:$9 sm:$0xff] %v1119_v42  ;;  %v1145_v42 = vperm.slane %v943_v30, 5 }
 0x29a   : > { %1399 = vst [vmem:[#allocation1 + $0x4] ss:$9 sm:$0xff] %v1120_v45  ;;  %v1147_v45 = vperm.slane %v943_v30, 7 }
 0x29b   : > { %1400 = vst [vmem:[#allocation1 + $0x5] ss:$9 sm:$0xff] %v1121_v44  ;;  %1567 = vperm.xlu2 %2020, %v2381_v46   ;;  %v747_v44 = vpop.f32.mrf.mxu2  ;;  %v1556_v46 = vpop.permute.xlu1 %1555 }
 0x29c   : > { %1401 = vst [vmem:[#allocation1 + $0x6] ss:$9 sm:$0xff] %v1122_v47  ;;  %v1553_v47 = vpop.permute.xlu2 %1552 }
 0x29d   : > { %1402 = vst [vmem:[#allocation1 + $0x7] ss:$9 sm:$0xff] %v1123_v48 }
 0x2a3   : > { %v2479_v48 = vpop.f32.mrf.mxu2 }
 0x2a4   : > { %v2447_v54 = vld [vmem:[#allocation1] sm:$0xff]  ;;  %902 = vadd.xlane.f32.xlu1 %v901_v3 }
 0x2a5   : > { %1404 = vst [vmem:[#allocation1] ss:$9 sm:$0xff] %v1124_v51  ;;  %v2482_v51 = vadd.s32 4294967264, %v2409_v0 }
 0x2a6   : > { %1405 = vst [vmem:[#allocation1 + $0x1] ss:$9 sm:$0xff] %v1125_v52 }
 0x2a7   : > { %1406 = vst [vmem:[#allocation1 + $0x2] ss:$9 sm:$0xff] %v1126_v53  ;;  %v743_v53 = vadd.f32 %v2452_v60, %v2445_v50 }
 0x2a8   : > { %1407 = vst [vmem:[#allocation1 + $0x3] ss:$9 sm:$0xff] %v1127_v56  ;;  %v2488_v56 = vadd.s32 4294967256, %v2409_v0 }
 0x2a9   : > { %1408 = vst [vmem:[#allocation1 + $0x4] ss:$9 sm:$0xff] %v1128_v58  ;;  %1582 = vperm.xlu0 %2021, %v2425_v24   ;;  %v783_v2 = vmax.f32 %v743_v53, 0.0 }
 0x2aa   : > { %1409 = vst [vmem:[#allocation1 + $0x5] ss:$9 sm:$0xff] %v1129_v59  ;;  %v1655_v50 = vperm.slane %v1556_v46, %v2488_v56 }
 0x2ab   : > { %1410 = vst [vmem:[#allocation1 + $0x6] ss:$9 sm:$0xff] %v1130_v61  ;;  %v1651_v61 = vperm.slane %v1553_v47, %v2482_v51  ;;  %v819_v15 = vmul.f32 %v2461_v6, %v783_v2 }
 0x2ac   : > { %1411 = vst [vmem:[#allocation1 + $0x7] ss:$9 sm:$0xff] %v1131_v63 }
 0x2ad   : > { %v1653_v8 = vsel %vm1652_vm5, %v1651_v61, %v2441_v12 }
 0x2b3   : > { %v2464_v13 = vld [vmem:[#allocation1] sm:$0xff] }
 0x2b4   : > { %1413 = vst [vmem:[#allocation1] ss:$9 sm:$0xff] %v1132_v23 }
 0x2b5   : > { %1414 = vst [vmem:[#allocation1 + $0x1] ss:$9 sm:$0xff] %v1133_v10  ;;  %v888_v49 = vpop.xlane.xlu2 %887 }
 0x2b6   : > { %1415 = vst [vmem:[#allocation1 + $0x2] ss:$9 sm:$0xff] %v1134_v11  ;;  %v944_v52 = vadd.f32 %v2340_v9, %v888_v49 }
 0x2b7   : > { %1416 = vst [vmem:[#allocation1 + $0x3] ss:$9 sm:$0xff] %v1135_v14  ;;  %v1657_v14 = vsel %vm1656_vm6, %v1655_v50, %v1653_v8 }
 0x2b8   : > { %1417 = vst [vmem:[#allocation1 + $0x4] ss:$9 sm:$0xff] %v1136_v16  ;;  %v1148_v24 = vperm.slane %v944_v52, 0  ;;  %v1149_v58 = vperm.slane %v944_v52, 1  ;;  %v1150_v59 = vperm.slane %v944_v52, 2  ;;  %v1152_v63 = vperm.slane %v944_v52, 4 }
 0x2b9   : > { %1418 = vst [vmem:[#allocation1 + $0x5] ss:$9 sm:$0xff] %v1137_v20  ;;  %v1153_v4 = vperm.slane %v944_v52, 5  ;;  %v1154_v5 = vperm.slane %v944_v52, 6  ;;  %v1155_v21 = vperm.slane %v944_v52, 7  ;;  %v752_v40 = vpop.f32.mrf.mxu2  ;;  %v891_v20 = vpop.xlane.xlu0 %890 }
 0x2ba   : > { %1419 = vst [vmem:[#allocation1 + $0x6] ss:$9 sm:$0xff] %v1138_v22  ;;  %v753_v10 = vadd.f32 %v2452_v60, %v752_v40  ;;  %v945_v12 = vadd.f32 %v2340_v9, %v891_v20 }
 0x2bb   : > { %1420 = vst [vmem:[#allocation1 + $0x7] ss:$9 sm:$0xff] %v1139_v25  ;;  %v904_v25 = vsel %vm825_vm1, %v819_v15, 0.0 }
 0x2bc   : > { %v787_v16 = vmax.f32 %v753_v10, 0.0  ;;  %v1156_v27 = vperm.slane %v945_v12, 0  ;;  %v1157_v28 = vperm.slane %v945_v12, 1  ;;  %v1158_v29 = vperm.slane %v945_v12, 2 }
 0x2bd   : > { %1570 = vperm.xlu1 %2022, %v2386_v62   ;;  %v1151_v62 = vperm.slane %v944_v52, 3  ;;  %v1559_v23 = vpop.permute.xlu2 %1558  ;;  %v1161_v34 = vperm.slane %v945_v12, 5 }
 0x2be   : > { %v1659_v11 = vperm.slane %v1559_v23, %v2494_v1  ;;  %v823_v22 = vmul.f32 %v2461_v6, %v787_v16  ;;  %v750_v23 = vadd.f32 %v2452_v60, %v2479_v48 }
 0x2c0   : > { %v1661_v17 = vsel %vm1660_vm7, %v1659_v11, %v1657_v14  ;;  %v916_v26 = vsel %vm825_vm1, %v823_v22, 0.0  ;;  %v786_v20 = vmax.f32 %v750_v23, 0.0 }
 0x2c2   : > { %v2473_v36 = vld [vmem:[#allocation1] sm:$0xff] }
 0x2c3   : > { %1422 = vst [vmem:[#allocation1] ss:$9 sm:$0xff] %v1140_v31  ;;  %v1159_v31 = vperm.slane %v945_v12, 3 }
 0x2c4   : > { %1423 = vst [vmem:[#allocation1 + $0x1] ss:$9 sm:$0xff] %v1141_v32  ;;  %905 = vadd.xlane.f32.xlu2 %v904_v25  ;;  %v1160_v32 = vperm.slane %v945_v12, 4 }
 0x2c5   : > { %1424 = vst [vmem:[#allocation1 + $0x2] ss:$9 sm:$0xff] %v1142_v33  ;;  %v748_v33 = vadd.f32 %v2452_v60, %v747_v44 }
 0x2c6   : > { %1425 = vst [vmem:[#allocation1 + $0x3] ss:$9 sm:$0xff] %v1143_v38  ;;  %v1162_v38 = vperm.slane %v945_v12, 6 }
 0x2c7   : > { %1426 = vst [vmem:[#allocation1 + $0x4] ss:$9 sm:$0xff] %v1144_v39 }
 0x2c8   : > { %1427 = vst [vmem:[#allocation1 + $0x5] ss:$9 sm:$0xff] %v1145_v42  ;;  %v1163_v42 = vperm.slane %v945_v12, 7 }
 0x2c9   : > { %1428 = vst [vmem:[#allocation1 + $0x6] ss:$9 sm:$0xff] %v1146_v43  ;;  %v785_v43 = vmax.f32 %v748_v33, 0.0 }
 0x2ca   : > { %1429 = vst [vmem:[#allocation1 + $0x7] ss:$9 sm:$0xff] %v1147_v45 }
 0x2cb   : > { %v821_v45 = vmul.f32 %v2461_v6, %v785_v43 }
 0x2cd   : > { %v910_v46 = vsel %vm825_vm1, %v821_v45, 0.0 }
 0x2d1   : > { %v2490_v19 = vld [vmem:[#allocation1] sm:$0xff] }
 0x2d2   : > { %1431 = vst [vmem:[#allocation1] ss:$9 sm:$0xff] %v1148_v24 }
 0x2d3   : > { %1432 = vst [vmem:[#allocation1 + $0x1] ss:$9 sm:$0xff] %v1149_v58  ;;  %917 = vadd.xlane.f32.xlu0 %v916_v26  ;;  %v822_v26 = vmul.f32 %v2461_v6, %v786_v20 }
 0x2d4   : > { %1433 = vst [vmem:[#allocation1 + $0x2] ss:$9 sm:$0xff] %v1150_v59  ;;  %v894_v39 = vpop.xlane.xlu1 %893 }
 0x2d5   : > { %1434 = vst [vmem:[#allocation1 + $0x3] ss:$9 sm:$0xff] %v1151_v62  ;;  %v946_v3 = vadd.f32 %v2340_v9, %v894_v39  ;;  %v2515_v62 = vadd.s32 4294967240, %v2409_v0  ;;  %v754_v39 = vpop.f32.mrf.mxu2 }
 0x2d6   : > { %1435 = vst [vmem:[#allocation1 + $0x4] ss:$9 sm:$0xff] %v1152_v63  ;;  %v755_v45 = vadd.f32 %v2452_v60, %v754_v39 }
 0x2d7   : > { %1436 = vst [vmem:[#allocation1 + $0x5] ss:$9 sm:$0xff] %v1153_v4  ;;  %v1164_v47 = vperm.slane %v946_v3, 0  ;;  %v1165_v49 = vperm.slane %v946_v3, 1  ;;  %v1166_v52 = vperm.slane %v946_v3, 2  ;;  %v1167_v44 = vperm.slane %v946_v3, 3 }
 0x2d8   : > { %1437 = vst [vmem:[#allocation1 + $0x6] ss:$9 sm:$0xff] %v1154_v5  ;;  %v1168_v24 = vperm.slane %v946_v3, 4  ;;  %v1169_v58 = vperm.slane %v946_v3, 5  ;;  %v1170_v59 = vperm.slane %v946_v3, 6  ;;  %v1171_v61 = vperm.slane %v946_v3, 7  ;;  %v1565_v5 = vpop.permute.xlu0 %1564 }
 0x2d9   : > { %1438 = vst [vmem:[#allocation1 + $0x7] ss:$9 sm:$0xff] %v1155_v21  ;;  %v2522_v4 = vadd.s32 4294967232, %v2409_v0 }
 0x2db   : > { %v1667_v21 = vperm.slane %v1565_v5, %v2522_v4 }
 0x2dc   : > { %1576 = vperm.xlu2 %2020, %v2397_v35  }
 0x2e0   : > { %v1439_v30 = vld [vmem:[#allocation1] sm:$0xff] }
 0x2e1   : > { %1440 = vst [vmem:[#allocation1] ss:$9 sm:$0xff] %v1156_v27 }
 0x2e2   : > { %1441 = vst [vmem:[#allocation1 + $0x1] ss:$9 sm:$0xff] %v1157_v28  ;;  %v900_v28 = vpop.xlane.xlu0 %899 }
 0x2e3   : > { %1442 = vst [vmem:[#allocation1 + $0x2] ss:$9 sm:$0xff] %v1158_v29  ;;  %v913_v29 = vsel %vm825_vm1, %v822_v26, 0.0 }
 0x2e4   : > { %1443 = vst [vmem:[#allocation1 + $0x3] ss:$9 sm:$0xff] %v1159_v31 }
 0x2e5   : > { %1444 = vst [vmem:[#allocation1 + $0x4] ss:$9 sm:$0xff] %v1160_v32 }
 0x2e6   : > { %1445 = vst [vmem:[#allocation1 + $0x5] ss:$9 sm:$0xff] %v1161_v34 }
 0x2e7   : > { %1446 = vst [vmem:[#allocation1 + $0x6] ss:$9 sm:$0xff] %v1162_v38  ;;  %911 = vadd.xlane.f32.xlu1 %v910_v46  ;;  %1591 = vperm.xlu0 %2021, %v2464_v13  }
 0x2e8   : > { %1447 = vst [vmem:[#allocation1 + $0x7] ss:$9 sm:$0xff] %v1163_v42 }
 0x2ec   : > { %v1562_v63 = vpop.permute.xlu1 %1561 }
 0x2ed   : > { %v1663_v2 = vperm.slane %v1562_v63, %v2515_v62 }
 0x2ef   : > { %v2511_v53 = vld [vmem:[#allocation1] sm:$0xff]  ;;  %v1665_v50 = vsel %vm1664_vm8, %v1663_v2, %v1661_v17  ;;  %1600 = vperm.xlu0 %2021, %v1439_v30   ;;  %v2533_v17 = vadd.s32 4294967224, %v2409_v0  ;;  %v948_v30 = vadd.f32 %v2340_v9, %v900_v28 }
 0x2f0   : > { %1449 = vst [vmem:[#allocation1] ss:$9 sm:$0xff] %v1164_v47  ;;  %v1669_v13 = vsel %vm1668_vm9, %v1667_v21, %v1665_v50 }
 0x2f1   : > { %1450 = vst [vmem:[#allocation1 + $0x1] ss:$9 sm:$0xff] %v1165_v49  ;;  %v1180_v31 = vperm.slane %v948_v30, 0  ;;  %v1181_v32 = vperm.slane %v948_v30, 1  ;;  %v1182_v34 = vperm.slane %v948_v30, 2  ;;  %v1183_v38 = vperm.slane %v948_v30, 3 }
 0x2f2   : > { %1451 = vst [vmem:[#allocation1 + $0x2] ss:$9 sm:$0xff] %v1166_v52  ;;  %v1184_v42 = vperm.slane %v948_v30, 4  ;;  %v1185_v43 = vperm.slane %v948_v30, 5  ;;  %v1186_v3 = vperm.slane %v948_v30, 6  ;;  %v1187_v49 = vperm.slane %v948_v30, 7 }
 0x2f3   : > { %1452 = vst [vmem:[#allocation1 + $0x3] ss:$9 sm:$0xff] %v1167_v44  ;;  %v788_v44 = vmax.f32 %v755_v45, 0.0 }
 0x2f4   : > { %1453 = vst [vmem:[#allocation1 + $0x4] ss:$9 sm:$0xff] %v1168_v24 }
 0x2f5   : > { %1454 = vst [vmem:[#allocation1 + $0x5] ss:$9 sm:$0xff] %v1169_v58  ;;  %v824_v58 = vmul.f32 %v2461_v6, %v788_v44  ;;  %v2549_v6 = vadd.s32 4294967208, %v2409_v0 }
 0x2f6   : > { %1455 = vst [vmem:[#allocation1 + $0x6] ss:$9 sm:$0xff] %v1170_v59  ;;  %v897_v35 = vpop.xlane.xlu2 %896 }
 0x2f7   : > { %1456 = vst [vmem:[#allocation1 + $0x7] ss:$9 sm:$0xff] %v1171_v61  ;;  %v947_v40 = vadd.f32 %v2340_v9, %v897_v35  ;;  %v919_v60 = vsel %vm825_vm1, %v824_v58, 0.0  ;;  %v1574_v35 = vpop.permute.xlu0 %1573  ;;  %vm1730_vm1 = vcmask 1040384  }
 0x2f9   : > { %v1172_v8 = vperm.slane %v947_v40, 0  ;;  %v1173_v10 = vperm.slane %v947_v40, 1  ;;  %v1174_v11 = vperm.slane %v947_v40, 2  ;;  %v1175_v15 = vperm.slane %v947_v40, 3 }
 0x2fa   : > { %v1176_v16 = vperm.slane %v947_v40, 4  ;;  %v1177_v22 = vperm.slane %v947_v40, 5  ;;  %v1179_v12 = vperm.slane %v947_v40, 7 }
 0x2fe   : > { %v2530_v14 = vld [vmem:[#allocation1] sm:$0xff]  ;;  %v1568_v48 = vpop.permute.xlu2 %1567 }
 0x2ff   : > { %1458 = vst [vmem:[#allocation1] ss:$9 sm:$0xff] %v1172_v8  ;;  %v1671_v25 = vperm.slane %v1568_v48, %v2533_v17  ;;  %v1679_v8 = vperm.slane %v1574_v35, %v2549_v6 }
 0x300   : > { %1579 = vperm.xlu1 %2022, %v2405_v57   ;;  %1459 = vst [vmem:[#allocation1 + $0x1] ss:$9 sm:$0xff] %v1173_v10  ;;  %v1178_v57 = vperm.slane %v947_v40, 6 }
 0x301   : > { %1460 = vst [vmem:[#allocation1 + $0x2] ss:$9 sm:$0xff] %v1174_v11  ;;  %v1673_v27 = vsel %vm1672_vm10, %v1671_v25, %v1669_v13  ;;  %v2546_v13 = vadd.s32 4294967216, %v2409_v0  ;;  %v2561_v25 = vadd.s32 4294967200, %v2409_v0 }
 0x302   : > { %1461 = vst [vmem:[#allocation1 + $0x3] ss:$9 sm:$0xff] %v1175_v15 }
 0x303   : > { %1462 = vst [vmem:[#allocation1 + $0x4] ss:$9 sm:$0xff] %v1176_v16 }
 0x304   : > { %1463 = vst [vmem:[#allocation1 + $0x5] ss:$9 sm:$0xff] %v1177_v22 }
 0x305   : > { %1464 = vst [vmem:[#allocation1 + $0x6] ss:$9 sm:$0xff] %v1178_v57  ;;  %914 = vadd.xlane.f32.xlu2 %v913_v29 }
 0x306   : > { %1465 = vst [vmem:[#allocation1 + $0x7] ss:$9 sm:$0xff] %v1179_v12 }
 0x30d   : > { %v1466_v33 = vld [vmem:[#allocation1] sm:$0xff] }
 0x30e   : > { %1467 = vst [vmem:[#allocation1] ss:$9 sm:$0xff] %v1180_v31  ;;  %1609 = vperm.xlu0 %2021, %v1466_v33  }
 0x30f   : > { %1468 = vst [vmem:[#allocation1 + $0x1] ss:$9 sm:$0xff] %v1181_v32 }
 0x310   : > { %1469 = vst [vmem:[#allocation1 + $0x2] ss:$9 sm:$0xff] %v1182_v34 }
 0x311   : > { %1470 = vst [vmem:[#allocation1 + $0x3] ss:$9 sm:$0xff] %v1183_v38 }
 0x312   : > { %1471 = vst [vmem:[#allocation1 + $0x4] ss:$9 sm:$0xff] %v1184_v42 }
 0x313   : > { %1472 = vst [vmem:[#allocation1 + $0x5] ss:$9 sm:$0xff] %v1185_v43 }
 0x314   : > { %1473 = vst [vmem:[#allocation1 + $0x6] ss:$9 sm:$0xff] %v1186_v3 }
 0x315   : > { %1474 = vst [vmem:[#allocation1 + $0x7] ss:$9 sm:$0xff] %v1187_v49 }
 0x317   : > { %v903_v47 = vpop.xlane.xlu1 %902 }
 0x318   : > { %v949_v52 = vadd.f32 %v2340_v9, %v903_v47 }
 0x31a   : > { %v1188_v46 = vperm.slane %v949_v52, 0  ;;  %v1189_v24 = vperm.slane %v949_v52, 1  ;;  %v1190_v59 = vperm.slane %v949_v52, 2  ;;  %v1191_v63 = vperm.slane %v949_v52, 3 }
 0x31b   : > { %v1192_v2 = vperm.slane %v949_v52, 4  ;;  %v1193_v50 = vperm.slane %v949_v52, 5  ;;  %v1194_v5 = vperm.slane %v949_v52, 6  ;;  %v1195_v21 = vperm.slane %v949_v52, 7 }
 0x31c   : > { %v1475_v61 = vld [vmem:[#allocation1] sm:$0xff] }
 0x31d   : > { %1476 = vst [vmem:[#allocation1] ss:$9 sm:$0xff] %v1188_v46  ;;  %1585 = vperm.xlu2 %2020, %v2435_v41  }
 0x31e   : > { %1477 = vst [vmem:[#allocation1 + $0x1] ss:$9 sm:$0xff] %v1189_v24 }
 0x31f   : > { %1478 = vst [vmem:[#allocation1 + $0x2] ss:$9 sm:$0xff] %v1190_v59 }
 0x320   : > { %1479 = vst [vmem:[#allocation1 + $0x3] ss:$9 sm:$0xff] %v1191_v63  ;;  %v2572_v63 = vadd.s32 4294967184, %v2409_v0 }
 0x321   : > { %1480 = vst [vmem:[#allocation1 + $0x4] ss:$9 sm:$0xff] %v1192_v2 }
 0x322   : > { %1481 = vst [vmem:[#allocation1 + $0x5] ss:$9 sm:$0xff] %v1193_v50 }
 0x323   : > { %1482 = vst [vmem:[#allocation1 + $0x6] ss:$9 sm:$0xff] %v1194_v5 }
 0x324   : > { %1483 = vst [vmem:[#allocation1 + $0x7] ss:$9 sm:$0xff] %v1195_v21 }
 0x325   : > { %1594 = vperm.xlu2 %2020, %v2473_v36  }
 0x32a   : > { %920 = vadd.xlane.f32.xlu1 %v919_v60 }
 0x32b   : > { %v1484_v57 = vld [vmem:[#allocation1] sm:$0xff] }
 0x32d   : > { %1603 = vperm.xlu2 %2020, %v2511_v53  }
 0x32f   : > { %v1571_v40 = vpop.permute.xlu1 %1570 }
 0x330   : > { %v1675_v23 = vperm.slane %v1571_v40, %v2546_v13 }
 0x332   : > { %v1677_v10 = vsel %vm1676_vm11, %v1675_v23, %v1673_v27 }
 0x333   : > { %v1681_v41 = vsel %vm1680_vm12, %v1679_v8, %v1677_v10 }
 0x335   : > { %1612 = vperm.xlu2 %2020, %v1475_v61   ;;  %v2569_v61 = vadd.s32 4294967192, %v2409_v0 }
 0x337   : > { %v906_v11 = vpop.xlane.xlu2 %905 }
 0x338   : > { %v950_v15 = vadd.f32 %v2340_v9, %v906_v11 }
 0x33a   : > { %v1196_v16 = vperm.slane %v950_v15, 0  ;;  %v1197_v20 = vperm.slane %v950_v15, 1  ;;  %v1198_v22 = vperm.slane %v950_v15, 2  ;;  %v1199_v12 = vperm.slane %v950_v15, 3 }
 0x33b   : > { %v1200_v48 = vperm.slane %v950_v15, 4  ;;  %v1201_v36 = vperm.slane %v950_v15, 5  ;;  %v1202_v53 = vperm.slane %v950_v15, 6 }
 0x33c   : > { %1485 = vst [vmem:[#allocation1] ss:$9 sm:$0xff] %v1196_v16 }
 0x33d   : > { %1486 = vst [vmem:[#allocation1 + $0x1] ss:$9 sm:$0xff] %v1197_v20 }
 0x33e   : > { %1487 = vst [vmem:[#allocation1 + $0x2] ss:$9 sm:$0xff] %v1198_v22 }
 0x33f   : > { %1488 = vst [vmem:[#allocation1 + $0x3] ss:$9 sm:$0xff] %v1199_v12  ;;  %v1577_v26 = vpop.permute.xlu2 %1576 }
 0x340   : > { %1489 = vst [vmem:[#allocation1 + $0x4] ss:$9 sm:$0xff] %v1200_v48  ;;  %v1683_v27 = vperm.slane %v1577_v26, %v2561_v25 }
 0x341   : > { %1490 = vst [vmem:[#allocation1 + $0x5] ss:$9 sm:$0xff] %v1201_v36 }
 0x342   : > { %1491 = vst [vmem:[#allocation1 + $0x6] ss:$9 sm:$0xff] %v1202_v53  ;;  %v1685_v28 = vsel %vm1684_vm13, %v1683_v27, %v1681_v41 }
 0x343   : > { %1588 = vperm.xlu1 %2022, %v2447_v54   ;;  %v1203_v54 = vperm.slane %v950_v15, 7 }
 0x345   : > { %1492 = vst [vmem:[#allocation1 + $0x7] ss:$9 sm:$0xff] %v1203_v54 }
 0x34b   : > { %1597 = vperm.xlu1 %2022, %v2490_v19   ;;  %v909_v19 = vpop.xlane.xlu0 %908 }
 0x34c   : > { %v951_v30 = vadd.f32 %v2340_v9, %v909_v19  ;;  %v1493_v32 = vld [vmem:[#allocation1] sm:$0xff] }
 0x34d   : > { %1618 = vperm.xlu0 %2021, %v1493_v32  }
 0x34e   : > { %v1204_v29 = vperm.slane %v951_v30, 0  ;;  %v1205_v31 = vperm.slane %v951_v30, 1  ;;  %v1206_v33 = vperm.slane %v951_v30, 2  ;;  %v1207_v34 = vperm.slane %v951_v30, 3 }
 0x34f   : > { %v1208_v38 = vperm.slane %v951_v30, 4  ;;  %v1209_v39 = vperm.slane %v951_v30, 5  ;;  %v1210_v42 = vperm.slane %v951_v30, 6  ;;  %v1211_v3 = vperm.slane %v951_v30, 7 }
 0x350   : > { %1494 = vst [vmem:[#allocation1] ss:$9 sm:$0xff] %v1204_v29 }
 0x351   : > { %1495 = vst [vmem:[#allocation1 + $0x1] ss:$9 sm:$0xff] %v1205_v31 }
 0x352   : > { %1496 = vst [vmem:[#allocation1 + $0x2] ss:$9 sm:$0xff] %v1206_v33 }
 0x353   : > { %1606 = vperm.xlu1 %2022, %v2530_v14   ;;  %1497 = vst [vmem:[#allocation1 + $0x3] ss:$9 sm:$0xff] %v1207_v34  ;;  %v1583_v2 = vpop.permute.xlu0 %1582 }
 0x354   : > { %1498 = vst [vmem:[#allocation1 + $0x4] ss:$9 sm:$0xff] %v1208_v38  ;;  %v1691_v5 = vperm.slane %v1583_v2, %v2572_v63 }
 0x355   : > { %1499 = vst [vmem:[#allocation1 + $0x5] ss:$9 sm:$0xff] %v1209_v39 }
 0x356   : > { %1500 = vst [vmem:[#allocation1 + $0x6] ss:$9 sm:$0xff] %v1210_v42 }
 0x357   : > { %1501 = vst [vmem:[#allocation1 + $0x7] ss:$9 sm:$0xff] %v1211_v3 }
 0x35a   : > { %v912_v43 = vpop.xlane.xlu1 %911 }
 0x35b   : > { %1615 = vperm.xlu1 %2022, %v1484_v57   ;;  %v952_v14 = vadd.f32 %v2340_v9, %v912_v43  ;;  %v918_v12 = vpop.xlane.xlu0 %917 }
 0x35c   : > { %v954_v48 = vadd.f32 %v2340_v9, %v918_v12 }
 0x35d   : > { %v1212_v45 = vperm.slane %v952_v14, 0  ;;  %v1213_v47 = vperm.slane %v952_v14, 1  ;;  %v1214_v49 = vperm.slane %v952_v14, 2  ;;  %v1215_v44 = vperm.slane %v952_v14, 3 }
 0x35e   : > { %v1502_v52 = vld [vmem:[#allocation1] sm:$0xff]  ;;  %v1216_v46 = vperm.slane %v952_v14, 4  ;;  %v1217_v24 = vperm.slane %v952_v14, 5  ;;  %v1218_v58 = vperm.slane %v952_v14, 6  ;;  %v1219_v59 = vperm.slane %v952_v14, 7 }
 0x35f   : > { %1621 = vperm.xlu2 %2020, %v1502_v52   ;;  %1503 = vst [vmem:[#allocation1] ss:$9 sm:$0xff] %v1212_v45  ;;  %v1228_v36 = vperm.slane %v954_v48, 0  ;;  %v1229_v53 = vperm.slane %v954_v48, 1  ;;  %v1230_v54 = vperm.slane %v954_v48, 2  ;;  %v1231_v26 = vperm.slane %v954_v48, 3 }
 0x360   : > { %1504 = vst [vmem:[#allocation1 + $0x1] ss:$9 sm:$0xff] %v1213_v47  ;;  %v1233_v19 = vperm.slane %v954_v48, 5  ;;  %v1234_v30 = vperm.slane %v954_v48, 6  ;;  %v1235_v29 = vperm.slane %v954_v48, 7 }
 0x361   : > { %1505 = vst [vmem:[#allocation1 + $0x2] ss:$9 sm:$0xff] %v1214_v49 }
 0x362   : > { %1506 = vst [vmem:[#allocation1 + $0x3] ss:$9 sm:$0xff] %v1215_v44 }
 0x363   : > { %1507 = vst [vmem:[#allocation1 + $0x4] ss:$9 sm:$0xff] %v1216_v46  ;;  %v1592_v52 = vpop.permute.xlu0 %1591 }
 0x364   : > { %1508 = vst [vmem:[#allocation1 + $0x5] ss:$9 sm:$0xff] %v1217_v24 }
 0x365   : > { %1509 = vst [vmem:[#allocation1 + $0x6] ss:$9 sm:$0xff] %v1218_v58 }
 0x366   : > { %1510 = vst [vmem:[#allocation1 + $0x7] ss:$9 sm:$0xff] %v1219_v59  ;;  %v1699_v59 = vperm.slane %v1592_v52, %v2414_v7 }
 0x36b   : > { %v1601_v24 = vpop.permute.xlu0 %1600 }
 0x36d   : > { %v1511_v40 = vld [vmem:[#allocation1] sm:$0xff] }
 0x36e   : > { %1624 = vperm.xlu1 %2022, %v1511_v40  }
 0x372   : > { %v1580_v50 = vpop.permute.xlu1 %1579 }
 0x373   : > { %v1687_v60 = vperm.slane %v1580_v50, %v2569_v61 }
 0x375   : > { %v1689_v21 = vsel %vm1688_vm14, %v1687_v60, %v1685_v28  ;;  %v1232_v28 = vperm.slane %v954_v48, 4 }
 0x376   : > { %v2578_v35 = vsel %vm1692_vm15, %v1691_v5, %v1689_v21 }
 0x378   : > { %v915_v23 = vpop.xlane.xlu2 %914 }
 0x379   : > { %v953_v8 = vadd.f32 %v2340_v9, %v915_v23 }
 0x37b   : > { %v1220_v10 = vperm.slane %v953_v8, 0  ;;  %v1221_v41 = vperm.slane %v953_v8, 1  ;;  %v1222_v11 = vperm.slane %v953_v8, 2  ;;  %v1223_v15 = vperm.slane %v953_v8, 3 }
 0x37c   : > { %v1224_v16 = vperm.slane %v953_v8, 4  ;;  %v1225_v20 = vperm.slane %v953_v8, 5  ;;  %v1226_v22 = vperm.slane %v953_v8, 6  ;;  %v1227_v57 = vperm.slane %v953_v8, 7 }
 0x37d   : > { %1512 = vst [vmem:[#allocation1] ss:$9 sm:$0xff] %v1220_v10  ;;  %v1705_v10 = vperm.slane %v1601_v24, %v2482_v51 }
 0x37e   : > { %1513 = vst [vmem:[#allocation1 + $0x1] ss:$9 sm:$0xff] %v1221_v41 }
 0x37f   : > { %1514 = vst [vmem:[#allocation1 + $0x2] ss:$9 sm:$0xff] %v1222_v11 }
 0x380   : > { %1515 = vst [vmem:[#allocation1 + $0x3] ss:$9 sm:$0xff] %v1223_v15  ;;  %v1610_v40 = vpop.permute.xlu0 %1609 }
 0x381   : > { %1516 = vst [vmem:[#allocation1 + $0x4] ss:$9 sm:$0xff] %v1224_v16 }
 0x382   : > { %1517 = vst [vmem:[#allocation1 + $0x5] ss:$9 sm:$0xff] %v1225_v20 }
 0x383   : > { %1518 = vst [vmem:[#allocation1 + $0x6] ss:$9 sm:$0xff] %v1226_v22  ;;  %v1711_v22 = vperm.slane %v1610_v40, %v2515_v62 }
 0x384   : > { %1519 = vst [vmem:[#allocation1 + $0x7] ss:$9 sm:$0xff] %v1227_v57 }
 0x38b   : > { %v1520_v27 = vld [vmem:[#allocation1] sm:$0xff] }
 0x38c   : > { %1627 = vperm.xlu0 %2021, %v1520_v27   ;;  %1521 = vst [vmem:[#allocation1] ss:$9 sm:$0xff] %v1228_v36 }
 0x38d   : > { %1522 = vst [vmem:[#allocation1 + $0x1] ss:$9 sm:$0xff] %v1229_v53 }
 0x38e   : > { %1523 = vst [vmem:[#allocation1 + $0x2] ss:$9 sm:$0xff] %v1230_v54 }
 0x38f   : > { %1524 = vst [vmem:[#allocation1 + $0x3] ss:$9 sm:$0xff] %v1231_v26 }
 0x390   : > { %1525 = vst [vmem:[#allocation1 + $0x4] ss:$9 sm:$0xff] %v1232_v28 }
 0x391   : > { %1526 = vst [vmem:[#allocation1 + $0x5] ss:$9 sm:$0xff] %v1233_v19 }
 0x392   : > { %1527 = vst [vmem:[#allocation1 + $0x6] ss:$9 sm:$0xff] %v1234_v30 }
 0x393   : > { %1528 = vst [vmem:[#allocation1 + $0x7] ss:$9 sm:$0xff] %v1235_v29 }
 0x39a   : > { %v1529_v39 = vld [vmem:[#allocation1] sm:$0xff] }
 0x39b   : > { %1630 = vperm.xlu2 %2020, %v1529_v39  }
 0x39d   : > { %v921_v31 = vpop.xlane.xlu1 %920 }
 0x39e   : > { %v955_v32 = vadd.f32 %v2340_v9, %v921_v31  ;;  %v2583_v9 = vpop.permute.xlu2 %1585 }
 0x3a0   : > { %v1236_v33 = vperm.slane %v955_v32, 0  ;;  %v1237_v34 = vperm.slane %v955_v32, 1  ;;  %v1238_v38 = vperm.slane %v955_v32, 2  ;;  %v1239_v42 = vperm.slane %v955_v32, 3 }
 0x3a1   : > { %v1240_v43 = vperm.slane %v955_v32, 4  ;;  %v1241_v3 = vperm.slane %v955_v32, 5  ;;  %v1242_v14 = vperm.slane %v955_v32, 6  ;;  %v1243_v45 = vperm.slane %v955_v32, 7 }
 0x3a2   : > { %1530 = vst [vmem:[#allocation1] ss:$9 sm:$0xff] %v1236_v33 }
 0x3a3   : > { %1531 = vst [vmem:[#allocation1 + $0x1] ss:$9 sm:$0xff] %v1237_v34 }
 0x3a4   : > { %1532 = vst [vmem:[#allocation1 + $0x2] ss:$9 sm:$0xff] %v1238_v38 }
 0x3a5   : > { %1533 = vst [vmem:[#allocation1 + $0x3] ss:$9 sm:$0xff] %v1239_v42 }
 0x3a6   : > { %1534 = vst [vmem:[#allocation1 + $0x4] ss:$9 sm:$0xff] %v1240_v43  ;;  %v1595_v44 = vpop.permute.xlu2 %1594 }
 0x3a7   : > { %1535 = vst [vmem:[#allocation1 + $0x5] ss:$9 sm:$0xff] %v1241_v3  ;;  %v1701_v21 = vperm.slane %v1595_v44, %v2423_v18 }
 0x3a8   : > { %1536 = vst [vmem:[#allocation1 + $0x6] ss:$9 sm:$0xff] %v1242_v14 }
 0x3a9   : > { %1537 = vst [vmem:[#allocation1 + $0x7] ss:$9 sm:$0xff] %v1243_v45 }
 0x3ae   : > { %v1604_v2 = vpop.permute.xlu2 %1603 }
 0x3af   : > { %v1707_v7 = vperm.slane %v1604_v2, %v2488_v56 }
 0x3b0   : > { %v1538_v47 = vld [vmem:[#allocation1] sm:$0xff] }
 0x3b1   : > { %1633 = vperm.xlu1 %2022, %v1538_v47  }
 0x3b5   : > { %v1589_v49 = vpop.permute.xlu1 %1588 }
 0x3b6   : > { %v1698_v58 = vperm.slane %v1589_v49, %v2409_v0  ;;  %v1613_v15 = vpop.permute.xlu2 %1612 }
 0x3b8   : > { %v1700_v50 = vsel %vm1640_vm2, %v1699_v59, %v1698_v58  ;;  %vm1735_vm2 = vcmp.lt.s32.totalorder %v1635_v55, 256 }
 0x3b9   : > { %v1702_v23 = vsel %vm1644_vm3, %v1701_v21, %v1700_v50 }
 0x3bd   : > { %v1598_v46 = vpop.permute.xlu1 %1597 }
 0x3be   : > { %v1703_v60 = vperm.slane %v1598_v46, %v2433_v37  ;;  %v1622_v12 = vpop.permute.xlu2 %1621 }
 0x3bf   : > { %v1619_v20 = vpop.permute.xlu0 %1618  ;;  %v1719_v27 = vperm.slane %v1622_v12, %v2549_v6 }
 0x3c0   : > { %v1704_v8 = vsel %vm1648_vm4, %v1703_v60, %v1702_v23  ;;  %v1717_v53 = vperm.slane %v1619_v20, %v2546_v13 }
 0x3c1   : > { %v1706_v41 = vsel %vm1652_vm5, %v1705_v10, %v1704_v8 }
 0x3c2   : > { %v1708_v37 = vsel %vm1656_vm6, %v1707_v7, %v1706_v41 }
 0x3c5   : > { %v1607_v5 = vpop.permute.xlu1 %1606 }
 0x3c6   : > { %v1709_v11 = vperm.slane %v1607_v5, %v2494_v1  ;;  %v1713_v1 = vperm.slane %v1613_v15, %v2522_v4  ;;  %v1694_v4 = vadd.s32 4294967176, %v2409_v0 }
 0x3c8   : > { %v1710_v18 = vsel %vm1660_vm7, %v1709_v11, %v1708_v37 }
 0x3c9   : > { %v1712_v51 = vsel %vm1664_vm8, %v1711_v22, %v1710_v18 }
 0x3ca   : > { %v1714_v56 = vsel %vm1668_vm9, %v1713_v1, %v1712_v51 }
 0x3cd   : > { %v1616_v16 = vpop.permute.xlu1 %1615 }
 0x3ce   : > { %v1715_v57 = vperm.slane %v1616_v16, %v2533_v17 }
 0x3d0   : > { %v1716_v48 = vsel %vm1672_vm10, %v1715_v57, %v1714_v56 }
 0x3d1   : > { %v1718_v26 = vsel %vm1676_vm11, %v1717_v53, %v1716_v48 }
 0x3d2   : > { %v1720_v28 = vsel %vm1680_vm12, %v1719_v27, %v1718_v26 }
 0x3e0   : > { %v1625_v36 = vpop.permute.xlu1 %1624 }
 0x3e1   : > { %v1721_v62 = vperm.slane %v1625_v36, %v2561_v25 }
 0x3e3   : > { %v1722_v13 = vsel %vm1684_vm13, %v1721_v62, %v1720_v28 }
 0x3f5   : > { %v1631_v19 = vpop.permute.xlu2 %1630 }
 0x3f6   : > { %v1725_v6 = vperm.slane %v1631_v19, %v2572_v63 }
 0x3fe   : > { %v1628_v54 = vpop.permute.xlu0 %1627 }
 0x3ff   : > { %v1723_v17 = vperm.slane %v1628_v54, %v2569_v61  ;;  %v1695_v61 = vperm.slane %v2583_v9, %v1694_v4 }
 0x401   : > { %v1724_v30 = vsel %vm1688_vm14, %v1723_v17, %v1722_v13  ;;  %v1697_v33 = vsel %vm1696_vm0, %v1695_v61, %v2578_v35 }
 0x402   : > { %v1726_v0 = vsel %vm1692_vm15, %v1725_v6, %v1724_v30 }
 0x423   : > { %v1634_v25 = vpop.permute.xlu1 %1633 }
 0x424   : > { %v1727_v29 = vperm.slane %v1634_v25, %v1694_v4 }
 0x426   : > { %v1728_v31 = vsel %vm1696_vm0, %v1727_v29, %v1726_v0 }
 0x427   : > { %v1729_v32 = vrot.slane %v1728_v31, 7 }
 0x429   : > { %v1731_v63 = vsel %vm1730_vm1, %v1697_v33, %v1729_v32 }
 0x42a   : > { %1737 = vst.msk [vmem:[%s273_s6] sm:$0x3] %vm1735_vm2, %v1731_v63 }
 0x42b   : > { %2056 = shalt.err (!%p2053_p3)
}
 0x42c   : > { %1980 = dma.vmem_to_hbm [thread:$0]  (%p2175_p5), %s1752_s14, 32, %s1754_s15, %s1739_s22  }
 0x42d PF: > { %p1986_p4 = scmp.ge.s32.totalorder %s2091_s29, 2  ;;  %s1765_s23 = sand.u32 1, %s2079_s26  }
 0x42e   : > { %s1766_s25 = scalar_lea.sflag [#allocation4], %s1765_s23 }
 0x42f   : > { %p1983_p7 = pnand %p1986_p4, %p2179_p6 }
 0x431   : > { %p1984_p8 = pneg %p1983_p7 }
 0x433   : > { %2074 = dma.done.wait (%p1984_p8), %s1766_s25, 32  }
 0x434   : > { %2076 = vsyncadd (%p1984_p8), %s1766_s25, 4294967264  ;;  %p18_p9 = scmp.ge.s32.totalorder %s2162_s8, 4   ;;  %s2664_s26 = smov %s2083_s27 }
 0x435   : > { %s2665_s27 = smov %s2087_s28  ;;  %s2666_s28 = smov %s2173_s11 }
 0x436   : > { %s2667_s29 = smov %s2162_s8  ;;  %20 = sbr.rel (!%p18_p9) target bundleno = 5 (0x5), region = 90 }
 0x43b   :  { %1772 = vsyncpa [#allocation4], 1 }
 0x43c   :  { %1774 = vsyncpa [#allocation4 + $0x1], 1 }

</bundles_post_ra>
